<compile_context>
chip_gen: v5e
topology: v5e:2x2
jax: 0.10.0
libtpu: 0.0.40
codegen_flags: <defaults>
</compile_context>

<pallas_src>
import jax
import jax.numpy as jnp
from jax import lax
from jax.experimental import pallas as pl
from jax.experimental.pallas import tpu as pltpu


def _round_up(x, m):
    return ((x + m - 1) // m) * m


# --------------------------------------------------------------------------------------
# Kernel
# --------------------------------------------------------------------------------------
def char_encode_kernel(x_ref, w_in_ref, b_in_ref, whh_ref, wout_ref, bout_ref,
                       o_ref, g_ref):
    # x_ref   : (W, TN, 2E) f32   columns = [x[t] | x[W-1-t]]
    # w_in_ref: (2E, 8H)    f32   block-diagonal input->gates (both directions, biases folded)
    # b_in_ref: (1, 8H)     f32
    # whh_ref : (2H, 8H)    f32   block-diagonal hidden->gates
    # wout_ref: (2H, Hpad)  f32   output Linear weight^T, lane-padded to 128
    # bout_ref: (1, Hpad)   f32
    # o_ref   : (TN, Hpad)  f32
    # g_ref   : (W, TN, 8H) f32   VMEM scratch (precomputed gates, fused fwd|rev layout)
    Wt, TN, E2 = x_ref.shape
    H2 = whh_ref.shape[0]          # 2*H  (fused [fwd | rev] state width)
    G = 4 * H2                     # 8*H  (fused gate width)

    # ---- per-tile input projection: ONE big MXU matmul into VMEM scratch ----
    # Row t of the result is [fwd gates(t) | rev gates(W-1-t)], gate columns interleaved as
    # [i_f i_r f_f f_r o_f o_r g_f g_r]; both LSTM biases are folded in.
    x_flat = x_ref[...].reshape(Wt * TN, E2)
    proj = jnp.dot(x_flat, w_in_ref[...], preferred_element_type=jnp.float32)
    g_ref[...] = (proj + b_in_ref[...]).reshape(Wt, TN, G)

    whh = whh_ref[...]             # hoist weight load out of the recurrence

    def body(t, carry):
        h, c = carry               # fused state (TN, 2H) = [h_fwd | h_rev]
        gates = g_ref[t] + jnp.dot(h, whh, preferred_element_type=jnp.float32)
        sig = jax.nn.sigmoid(gates[:, :3 * H2])     # [i | f | o] in one pass
        g_act = jnp.tanh(gates[:, 3 * H2:])         # [g]
        i = sig[:, :H2]
        f = sig[:, H2:2 * H2]
        o = sig[:, 2 * H2:3 * H2]
        c = f * c + i * g_act
        h = o * jnp.tanh(c)
        return h, c

    zeros = jnp.zeros((TN, H2), jnp.float32)
    h, _ = lax.fori_loop(0, Wt, body, (zeros, zeros),
                         unroll=True if Wt <= 16 else 4)

    # torch.cat([hn[-2], hn[-1]], -1) -> Dropout (eval: identity) -> Linear.
    # h is already the fused [h_fwd | h_rev], so the Linear is a single matmul.
    # TODO(synk): training-mode Dropout(p=0.5) not implemented (identity == eval mode).
    y = jnp.dot(h, wout_ref[...], preferred_element_type=jnp.float32) + bout_ref[...]
    o_ref[...] = y.astype(o_ref.dtype)


# --------------------------------------------------------------------------------------
# Wrapper
# --------------------------------------------------------------------------------------
def _choose_tile_n(N, W, E, H, H_out, tile_n, vmem_budget):
    tile_n = max(8, min(_round_up(tile_n, 8), _round_up(N, 8)))
    # Ensure >= 2 grid steps when possible so the "parallel" axis shards across v7x's 2 TCs.
    if _round_up(N, tile_n) // tile_n < 2 and N > 8:
        tile_n = max(8, 8 * ((N + 15) // 16))

    def vmem_bytes(tn):
        x_buf = 2 * W * tn * (2 * E) * 4              # double-buffered input tile
        g_scr = W * tn * (8 * H) * 4                  # gates scratch
        o_buf = 2 * tn * H_out * 4                    # double-buffered output tile
        wgt = ((2 * E) * (8 * H) + (8 * H) + (2 * H) * (8 * H)
               + (2 * H) * H_out + H_out) * 4
        return x_buf + g_scr + o_buf + wgt

    # Shrink the tile until everything (incl. double buffers) fits the budget
    # (budget chosen to be safe on v5e's 16 MiB default scope and v7x's 64 MiB physical VMEM).
    while tile_n > 8 and vmem_bytes(tile_n) > vmem_budget:
        tile_n = max(8, _round_up(tile_n // 2, 8))
    return tile_n


def char_encode_forward(input_ids, params, *, tile_n=128,
                        vmem_budget=40 * 1024 * 1024):
    """input_ids: (B, S, W) int32. Returns (B, S, E) float32 (requires H == E)."""
    B, S, W = input_ids.shape
    emb = params["embedding"]
    E = emb.shape[1]
    H = params["hidden_dim"]
    H_out = params["wout"].shape[1]                 # lane-padded output width (>=128)
    assert H == E, "CharEncode's final reshape requires hidden_dim == embed_dim"

    N = B * S

    # XLA-side glue (all f32): embedding gather + [fwd | time-reversed] feature concat.
    x = jnp.take(emb, input_ids.reshape(N, W), axis=0)       # (N, W, E)
    x2 = jnp.concatenate([x, x[:, ::-1, :]], axis=-1)        # (N, W, 2E): [x[t] | x[W-1-t]]
    x2 = jnp.transpose(x2, (1, 0, 2))                        # (W, N, 2E) time-major

    tile_n = _choose_tile_n(N, W, E, H, H_out, tile_n, vmem_budget)
    N_pad = _round_up(N, tile_n)
    if N_pad != N:
        x2 = jnp.pad(x2, ((0, 0), (0, N_pad - N), (0, 0)))   # pad rows sliced off afterwards
    grid = (N_pad // tile_n,)

    full2d = lambda i: (0, 0)
    out = pl.pallas_call(
        char_encode_kernel,
        out_shape=jax.ShapeDtypeStruct((N_pad, H_out), jnp.float32),
        grid_spec=pltpu.PrefetchScalarGridSpec(
            num_scalar_prefetch=0,
            grid=grid,
            in_specs=[
                pl.BlockSpec((W, tile_n, 2 * E), lambda i: (0, i, 0)),  # x tile
                pl.BlockSpec((2 * E, 8 * H), full2d),                   # w_in (block-diag)
                pl.BlockSpec((1, 8 * H), full2d),                       # b_in
                pl.BlockSpec((2 * H, 8 * H), full2d),                   # whh (block-diag)
                pl.BlockSpec((2 * H, H_out), full2d),                   # wout (lane-padded)
                pl.BlockSpec((1, H_out), full2d),                       # bout
            ],
            out_specs=pl.BlockSpec((tile_n, H_out), lambda i: (i, 0)),
            scratch_shapes=[pltpu.VMEM((W, tile_n, 8 * H), jnp.float32)],
        ),
        compiler_params=pltpu.CompilerParams(
            dimension_semantics=("parallel",),
            vmem_limit_bytes=48 * 1024 * 1024,   # > v5e 16 MiB default, < v7x 64 MiB physical
        ),
    )(x2, params["w_in"], params["b_in"], params["whh"],
      params["wout"], params["bout"])

    return out[:N, :H].reshape(B, S, E)          # x.reshape(-1, S, E) in the PyTorch module


# --------------------------------------------------------------------------------------
# Parameters (torch layout) + fused kernel layout
# --------------------------------------------------------------------------------------
def make_raw_params(key, vocab_size, embed_dim, hidden_dim):
    V, E, H = vocab_size, embed_dim, hidden_dim
    ks = jax.random.split(key, 11)
    scale = 0.1

    emb = scale * jax.random.normal(ks[0], (V, E), jnp.float32)
    emb = emb.at[0].set(0.0)                                   # padding_idx=0

    def direction(k0, k1, k2, k3):
        wih = scale * jax.random.normal(k0, (4 * H, E), jnp.float32)   # torch weight_ih (4H,E), [i,f,g,o]
        whh = scale * jax.random.normal(k1, (4 * H, H), jnp.float32)   # torch weight_hh (4H,H)
        bih = scale * jax.random.normal(k2, (4 * H,), jnp.float32)
        bhh = scale * jax.random.normal(k3, (4 * H,), jnp.float32)
        return {"wih_t": wih.T, "whh_t": whh.T, "b": bih + bhh}        # transposed, biases folded

    fwd = direction(ks[1], ks[2], ks[3], ks[4])
    rev = direction(ks[5], ks[6], ks[7], ks[8])

    w_out = scale * jax.random.normal(ks[9], (H, 2 * H), jnp.float32)  # torch Linear weight (H, 2H)
    b_out = scale * jax.random.normal(ks[10], (H,), jnp.float32)

    return {"embedding": emb, "fwd": fwd, "rev": rev,
            "w_out": w_out, "b_out": b_out, "hidden_dim": H}


def fuse_params(raw):
    """Build the fused (bidirectional, gate-reordered, lane-padded) kernel weights."""
    emb = raw["embedding"]
    H = raw["hidden_dim"]
    H_out = _round_up(H, 128)     # lane-dense output (extra columns are zero, sliced off outside)

    def gate_cols(w):             # (in_dim, 4H) torch order [i,f,g,o] -> (i, f, o, g)
        return w[:, :H], w[:, H:2 * H], w[:, 3 * H:4 * H], w[:, 2 * H:3 * H]

    def block_diag(wf, wr):
        # (in_dim,4H) x2 -> (2*in_dim, 8H), gate columns interleaved [i_f i_r f_f f_r o_f o_r g_f g_r]
        D = wf.shape[0]
        z = jnp.zeros((D, H), jnp.float32)
        i_f, f_f, o_f, g_f = gate_cols(wf)
        i_r, f_r, o_r, g_r = gate_cols(wr)
        top = jnp.concatenate([i_f, z, f_f, z, o_f, z, g_f, z], axis=1)   # rows: fwd input/state
        bot = jnp.concatenate([z, i_r, z, f_r, z, o_r, z, g_r], axis=1)   # rows: rev input/state
        return jnp.concatenate([top, bot], axis=0)

    def fused_bias(bf, br):
        i_f, f_f, o_f, g_f = gate_cols(bf.reshape(1, 4 * H))
        i_r, f_r, o_r, g_r = gate_cols(br.reshape(1, 4 * H))
        return jnp.concatenate([i_f, i_r, f_f, f_r, o_f, o_r, g_f, g_r], axis=1)

    return {
        "embedding": emb,
        "w_in": block_diag(raw["fwd"]["wih_t"], raw["rev"]["wih_t"]),    # (2E, 8H)
        "b_in": fused_bias(raw["fwd"]["b"], raw["rev"]["b"]),            # (1, 8H)
        "whh": block_diag(raw["fwd"]["whh_t"], raw["rev"]["whh_t"]),     # (2H, 8H)
        "wout": jnp.pad(raw["w_out"].T, ((0, 0), (0, H_out - H))),       # (2H, H_out)
        "bout": jnp.pad(raw["b_out"], (0, H_out - H)).reshape(1, H_out), # (1, H_out)
        "hidden_dim": H,
    }


# --------------------------------------------------------------------------------------
# Pure-JAX reference (eval-mode forward of the PyTorch module)
# --------------------------------------------------------------------------------------
def char_encode_reference(input_ids, raw):
    emb = raw["embedding"]
    E = emb.shape[1]
    H = raw["hidden_dim"]
    B, S, W = input_ids.shape
    N = B * S
    x = jnp.take(emb, input_ids.reshape(N, W), axis=0)        # (N, W, E)

    def run(x_seq, p):
        h = jnp.zeros((N, H), jnp.float32)
        c = jnp.zeros((N, H), jnp.float32)
        for t in range(W):
            gates = x_seq[:, t] @ p["wih_t"] + h @ p["whh_t"] + p["b"]
            i = jax.nn.sigmoid(gates[:, :H])
            f = jax.nn.sigmoid(gates[:, H:2 * H])
            g = jnp.tanh(gates[:, 2 * H:3 * H])
            o = jax.nn.sigmoid(gates[:, 3 * H:])
            c = f * c + i * g
            h = o * jnp.tanh(c)
        return h

    hf = run(x, raw["fwd"])
    hr = run(x[:, ::-1], raw["rev"])
    cat = jnp.concatenate([hf, hr], axis=-1)
    # Dropout(p=0.5) in eval mode == identity
    y = cat @ raw["w_out"].T + raw["b_out"]
    return y.reshape(B, S, E)


# --------------------------------------------------------------------------------------
if __name__ == "__main__":
    vocab_size, embed_dim, hidden_dim = 50, 32, 32   # final reshape requires H == E
    B, S, W = 2, 8, 8

    key = jax.random.PRNGKey(0)
    k_params, k_ids = jax.random.split(key)
    raw = make_raw_params(k_params, vocab_size, embed_dim, hidden_dim)
    params = fuse_params(raw)

    input_ids = jax.random.randint(k_ids, (B, S, W), 0, vocab_size, dtype=jnp.int32)

    out = jax.block_until_ready(char_encode_forward(input_ids, params))
    assert out.shape == (B, S, embed_dim), out.shape
    assert bool(jnp.all(jnp.isfinite(out)))

    ref = jax.block_until_ready(char_encode_reference(input_ids, raw))
    max_err = float(jnp.max(jnp.abs(out - ref)))
    assert max_err < 5e-3, f"max abs error vs reference: {max_err}"

    print("KERNEL_OK")
</pallas_src>

<mosaic_0001>
module attributes {stable_mosaic.version = 11 : i64} {
  func.func @char_encode_kernel(%arg0: i32, %arg1: memref<8x8x64xf32, #tpu.memory_space<vmem>>, %arg2: memref<64x256xf32, #tpu.memory_space<vmem>>, %arg3: memref<1x256xf32, #tpu.memory_space<vmem>>, %arg4: memref<64x256xf32, #tpu.memory_space<vmem>>, %arg5: memref<64x128xf32, #tpu.memory_space<vmem>>, %arg6: memref<1x128xf32, #tpu.memory_space<vmem>>, %arg7: memref<8x128xf32, #tpu.memory_space<vmem>>, %arg8: memref<8x8x256xf32, #tpu.memory_space<vmem>>) attributes {dimension_semantics = [#tpu.dimension_semantics<parallel>], iteration_bounds = array<i64: 2>, scalar_prefetch = 0 : i64, scratch_operands = 1 : i64, tpu.core_type = #tpu.core_type<tc>, window_params = [{transform_indices = @transform_0, window_bounds = array<i64: 8, 8, 64>}, {pipeline_mode = #tpu.pipeline_mode<synchronous>, transform_indices = @transform_1, window_bounds = array<i64: 64, 256>}, {pipeline_mode = #tpu.pipeline_mode<synchronous>, transform_indices = @transform_2, window_bounds = array<i64: 1, 256>}, {pipeline_mode = #tpu.pipeline_mode<synchronous>, transform_indices = @transform_3, window_bounds = array<i64: 64, 256>}, {pipeline_mode = #tpu.pipeline_mode<synchronous>, transform_indices = @transform_4, window_bounds = array<i64: 64, 128>}, {pipeline_mode = #tpu.pipeline_mode<synchronous>, transform_indices = @transform_5, window_bounds = array<i64: 1, 128>}, {transform_indices = @transform_6, window_bounds = array<i64: 8, 128>}]} {
    %c0 = arith.constant 0 : index
    %c0_0 = arith.constant 0 : index
    %c0_1 = arith.constant 0 : index
    %0 = vector.load %arg1[%c0, %c0_0, %c0_1] : memref<8x8x64xf32, #tpu.memory_space<vmem>>, vector<8x8x64xf32>
    %1 = vector.shape_cast %0 : vector<8x8x64xf32> to vector<64x64xf32>
    %c0_2 = arith.constant 0 : index
    %c0_3 = arith.constant 0 : index
    %2 = vector.load %arg2[%c0_2, %c0_3] : memref<64x256xf32, #tpu.memory_space<vmem>>, vector<64x256xf32>
    %cst = arith.constant dense<0.000000e+00> : vector<64x256xf32>
    %3 = tpu.matmul %1, %2, %cst {dimension_numbers = #tpu.dot_dimension_numbers<[1], [0], [0], [1], [0, 0, 1, 1], [], []>} : vector<64x64xf32>, vector<64x256xf32>, vector<64x256xf32> -> vector<64x256xf32>
    %c0_4 = arith.constant 0 : index
    %c0_5 = arith.constant 0 : index
    %4 = vector.load %arg3[%c0_4, %c0_5] : memref<1x256xf32, #tpu.memory_space<vmem>>, vector<1x256xf32>
    %5 = vector.broadcast %4 : vector<1x256xf32> to vector<64x256xf32>
    %6 = arith.addf %3, %5 : vector<64x256xf32>
    %7 = vector.shape_cast %6 : vector<64x256xf32> to vector<8x8x256xf32>
    %c0_6 = arith.constant 0 : index
    %c0_7 = arith.constant 0 : index
    %c0_8 = arith.constant 0 : index
    %8 = vector.load %arg8[%c0_6, %c0_7, %c0_8] : memref<8x8x256xf32, #tpu.memory_space<vmem>>, vector<8x8x256xf32>
    tpu.vector_store %arg8[%c0_6, %c0_7, %c0_8], %7 {strides = array<i32>} : memref<8x8x256xf32, #tpu.memory_space<vmem>>, vector<8x8x256xf32>,
    %c0_9 = arith.constant 0 : index
    %c0_10 = arith.constant 0 : index
    %9 = vector.load %arg4[%c0_9, %c0_10] : memref<64x256xf32, #tpu.memory_space<vmem>>, vector<64x256xf32>
    %cst_11 = arith.constant 0.000000e+00 : f32
    %10 = vector.broadcast %cst_11 : f32 to vector<8x64xf32>
    %c0_i32 = arith.constant 0 : i32
    %11 = arith.index_cast %c0_i32 : i32 to index
    %c0_12 = arith.constant 0 : index
    %c0_13 = arith.constant 0 : index
    %12 = vector.load %arg8[%11, %c0_12, %c0_13] : memref<8x8x256xf32, #tpu.memory_space<vmem>>, vector<1x8x256xf32>
    %13 = vector.shape_cast %12 : vector<1x8x256xf32> to vector<8x256xf32>
    %cst_14 = arith.constant dense<0.000000e+00> : vector<8x256xf32>
    %14 = tpu.matmul %10, %9, %cst_14 {dimension_numbers = #tpu.dot_dimension_numbers<[1], [0], [0], [1], [0, 0, 1, 1], [], []>} : vector<8x64xf32>, vector<64x256xf32>, vector<8x256xf32> -> vector<8x256xf32>
    %15 = arith.addf %13, %14 : vector<8x256xf32>
    %16 = vector.extract_strided_slice %15 {offsets = [0, 0], sizes = [8, 192], strides = [1, 1]} : vector<8x256xf32> to vector<8x192xf32>
    %17 = arith.negf %16 : vector<8x192xf32>
    %18 = math.exp %17 : vector<8x192xf32>
    %cst_15 = arith.constant 1.000000e+00 : f32
    %19 = vector.broadcast %cst_15 : f32 to vector<8x192xf32>
    %20 = arith.addf %19, %18 : vector<8x192xf32>
    %21 = arith.divf %19, %20 : vector<8x192xf32>
    %22 = vector.extract_strided_slice %15 {offsets = [0, 192], sizes = [8, 64], strides = [1, 1]} : vector<8x256xf32> to vector<8x64xf32>
    %23 = math.tanh %22 : vector<8x64xf32>
    %24 = vector.extract_strided_slice %21 {offsets = [0, 0], sizes = [8, 64], strides = [1, 1]} : vector<8x192xf32> to vector<8x64xf32>
    %25 = vector.extract_strided_slice %21 {offsets = [0, 64], sizes = [8, 64], strides = [1, 1]} : vector<8x192xf32> to vector<8x64xf32>
    %26 = vector.extract_strided_slice %21 {offsets = [0, 128], sizes = [8, 64], strides = [1, 1]} : vector<8x192xf32> to vector<8x64xf32>
    %27 = arith.mulf %25, %10 : vector<8x64xf32>
    %28 = arith.mulf %24, %23 : vector<8x64xf32>
    %29 = arith.addf %27, %28 : vector<8x64xf32>
    %30 = math.tanh %29 : vector<8x64xf32>
    %31 = arith.mulf %26, %30 : vector<8x64xf32>
    %c1_i32 = arith.constant 1 : i32
    %32 = arith.index_cast %c1_i32 : i32 to index
    %c0_16 = arith.constant 0 : index
    %c0_17 = arith.constant 0 : index
    %33 = vector.load %arg8[%32, %c0_16, %c0_17] : memref<8x8x256xf32, #tpu.memory_space<vmem>>, vector<1x8x256xf32>
    %34 = vector.shape_cast %33 : vector<1x8x256xf32> to vector<8x256xf32>
    %cst_18 = arith.constant dense<0.000000e+00> : vector<8x256xf32>
    %35 = tpu.matmul %31, %9, %cst_18 {dimension_numbers = #tpu.dot_dimension_numbers<[1], [0], [0], [1], [0, 0, 1, 1], [], []>} : vector<8x64xf32>, vector<64x256xf32>, vector<8x256xf32> -> vector<8x256xf32>
    %36 = arith.addf %34, %35 : vector<8x256xf32>
    %37 = vector.extract_strided_slice %36 {offsets = [0, 0], sizes = [8, 192], strides = [1, 1]} : vector<8x256xf32> to vector<8x192xf32>
    %38 = arith.negf %37 : vector<8x192xf32>
    %39 = math.exp %38 : vector<8x192xf32>
    %cst_19 = arith.constant 1.000000e+00 : f32
    %40 = vector.broadcast %cst_19 : f32 to vector<8x192xf32>
    %41 = arith.addf %40, %39 : vector<8x192xf32>
    %42 = arith.divf %40, %41 : vector<8x192xf32>
    %43 = vector.extract_strided_slice %36 {offsets = [0, 192], sizes = [8, 64], strides = [1, 1]} : vector<8x256xf32> to vector<8x64xf32>
    %44 = math.tanh %43 : vector<8x64xf32>
    %45 = vector.extract_strided_slice %42 {offsets = [0, 0], sizes = [8, 64], strides = [1, 1]} : vector<8x192xf32> to vector<8x64xf32>
    %46 = vector.extract_strided_slice %42 {offsets = [0, 64], sizes = [8, 64], strides = [1, 1]} : vector<8x192xf32> to vector<8x64xf32>
    %47 = vector.extract_strided_slice %42 {offsets = [0, 128], sizes = [8, 64], strides = [1, 1]} : vector<8x192xf32> to vector<8x64xf32>
    %48 = arith.mulf %46, %29 : vector<8x64xf32>
    %49 = arith.mulf %45, %44 : vector<8x64xf32>
    %50 = arith.addf %48, %49 : vector<8x64xf32>
    %51 = math.tanh %50 : vector<8x64xf32>
    %52 = arith.mulf %47, %51 : vector<8x64xf32>
    %c2_i32 = arith.constant 2 : i32
    %53 = arith.index_cast %c2_i32 : i32 to index
    %c0_20 = arith.constant 0 : index
    %c0_21 = arith.constant 0 : index
    %54 = vector.load %arg8[%53, %c0_20, %c0_21] : memref<8x8x256xf32, #tpu.memory_space<vmem>>, vector<1x8x256xf32>
    %55 = vector.shape_cast %54 : vector<1x8x256xf32> to vector<8x256xf32>
    %cst_22 = arith.constant dense<0.000000e+00> : vector<8x256xf32>
    %56 = tpu.matmul %52, %9, %cst_22 {dimension_numbers = #tpu.dot_dimension_numbers<[1], [0], [0], [1], [0, 0, 1, 1], [], []>} : vector<8x64xf32>, vector<64x256xf32>, vector<8x256xf32> -> vector<8x256xf32>
    %57 = arith.addf %55, %56 : vector<8x256xf32>
    %58 = vector.extract_strided_slice %57 {offsets = [0, 0], sizes = [8, 192], strides = [1, 1]} : vector<8x256xf32> to vector<8x192xf32>
    %59 = arith.negf %58 : vector<8x192xf32>
    %60 = math.exp %59 : vector<8x192xf32>
    %cst_23 = arith.constant 1.000000e+00 : f32
    %61 = vector.broadcast %cst_23 : f32 to vector<8x192xf32>
    %62 = arith.addf %61, %60 : vector<8x192xf32>
    %63 = arith.divf %61, %62 : vector<8x192xf32>
    %64 = vector.extract_strided_slice %57 {offsets = [0, 192], sizes = [8, 64], strides = [1, 1]} : vector<8x256xf32> to vector<8x64xf32>
    %65 = math.tanh %64 : vector<8x64xf32>
    %66 = vector.extract_strided_slice %63 {offsets = [0, 0], sizes = [8, 64], strides = [1, 1]} : vector<8x192xf32> to vector<8x64xf32>
    %67 = vector.extract_strided_slice %63 {offsets = [0, 64], sizes = [8, 64], strides = [1, 1]} : vector<8x192xf32> to vector<8x64xf32>
    %68 = vector.extract_strided_slice %63 {offsets = [0, 128], sizes = [8, 64], strides = [1, 1]} : vector<8x192xf32> to vector<8x64xf32>
    %69 = arith.mulf %67, %50 : vector<8x64xf32>
    %70 = arith.mulf %66, %65 : vector<8x64xf32>
    %71 = arith.addf %69, %70 : vector<8x64xf32>
    %72 = math.tanh %71 : vector<8x64xf32>
    %73 = arith.mulf %68, %72 : vector<8x64xf32>
    %c3_i32 = arith.constant 3 : i32
    %74 = arith.index_cast %c3_i32 : i32 to index
    %c0_24 = arith.constant 0 : index
    %c0_25 = arith.constant 0 : index
    %75 = vector.load %arg8[%74, %c0_24, %c0_25] : memref<8x8x256xf32, #tpu.memory_space<vmem>>, vector<1x8x256xf32>
    %76 = vector.shape_cast %75 : vector<1x8x256xf32> to vector<8x256xf32>
    %cst_26 = arith.constant dense<0.000000e+00> : vector<8x256xf32>
    %77 = tpu.matmul %73, %9, %cst_26 {dimension_numbers = #tpu.dot_dimension_numbers<[1], [0], [0], [1], [0, 0, 1, 1], [], []>} : vector<8x64xf32>, vector<64x256xf32>, vector<8x256xf32> -> vector<8x256xf32>
    %78 = arith.addf %76, %77 : vector<8x256xf32>
    %79 = vector.extract_strided_slice %78 {offsets = [0, 0], sizes = [8, 192], strides = [1, 1]} : vector<8x256xf32> to vector<8x192xf32>
    %80 = arith.negf %79 : vector<8x192xf32>
    %81 = math.exp %80 : vector<8x192xf32>
    %cst_27 = arith.constant 1.000000e+00 : f32
    %82 = vector.broadcast %cst_27 : f32 to vector<8x192xf32>
    %83 = arith.addf %82, %81 : vector<8x192xf32>
    %84 = arith.divf %82, %83 : vector<8x192xf32>
    %85 = vector.extract_strided_slice %78 {offsets = [0, 192], sizes = [8, 64], strides = [1, 1]} : vector<8x256xf32> to vector<8x64xf32>
    %86 = math.tanh %85 : vector<8x64xf32>
    %87 = vector.extract_strided_slice %84 {offsets = [0, 0], sizes = [8, 64], strides = [1, 1]} : vector<8x192xf32> to vector<8x64xf32>
    %88 = vector.extract_strided_slice %84 {offsets = [0, 64], sizes = [8, 64], strides = [1, 1]} : vector<8x192xf32> to vector<8x64xf32>
    %89 = vector.extract_strided_slice %84 {offsets = [0, 128], sizes = [8, 64], strides = [1, 1]} : vector<8x192xf32> to vector<8x64xf32>
    %90 = arith.mulf %88, %71 : vector<8x64xf32>
    %91 = arith.mulf %87, %86 : vector<8x64xf32>
    %92 = arith.addf %90, %91 : vector<8x64xf32>
    %93 = math.tanh %92 : vector<8x64xf32>
    %94 = arith.mulf %89, %93 : vector<8x64xf32>
    %c4_i32 = arith.constant 4 : i32
    %95 = arith.index_cast %c4_i32 : i32 to index
    %c0_28 = arith.constant 0 : index
    %c0_29 = arith.constant 0 : index
    %96 = vector.load %arg8[%95, %c0_28, %c0_29] : memref<8x8x256xf32, #tpu.memory_space<vmem>>, vector<1x8x256xf32>
    %97 = vector.shape_cast %96 : vector<1x8x256xf32> to vector<8x256xf32>
    %cst_30 = arith.constant dense<0.000000e+00> : vector<8x256xf32>
    %98 = tpu.matmul %94, %9, %cst_30 {dimension_numbers = #tpu.dot_dimension_numbers<[1], [0], [0], [1], [0, 0, 1, 1], [], []>} : vector<8x64xf32>, vector<64x256xf32>, vector<8x256xf32> -> vector<8x256xf32>
    %99 = arith.addf %97, %98 : vector<8x256xf32>
    %100 = vector.extract_strided_slice %99 {offsets = [0, 0], sizes = [8, 192], strides = [1, 1]} : vector<8x256xf32> to vector<8x192xf32>
    %101 = arith.negf %100 : vector<8x192xf32>
    %102 = math.exp %101 : vector<8x192xf32>
    %cst_31 = arith.constant 1.000000e+00 : f32
    %103 = vector.broadcast %cst_31 : f32 to vector<8x192xf32>
    %104 = arith.addf %103, %102 : vector<8x192xf32>
    %105 = arith.divf %103, %104 : vector<8x192xf32>
    %106 = vector.extract_strided_slice %99 {offsets = [0, 192], sizes = [8, 64], strides = [1, 1]} : vector<8x256xf32> to vector<8x64xf32>
    %107 = math.tanh %106 : vector<8x64xf32>
    %108 = vector.extract_strided_slice %105 {offsets = [0, 0], sizes = [8, 64], strides = [1, 1]} : vector<8x192xf32> to vector<8x64xf32>
    %109 = vector.extract_strided_slice %105 {offsets = [0, 64], sizes = [8, 64], strides = [1, 1]} : vector<8x192xf32> to vector<8x64xf32>
    %110 = vector.extract_strided_slice %105 {offsets = [0, 128], sizes = [8, 64], strides = [1, 1]} : vector<8x192xf32> to vector<8x64xf32>
    %111 = arith.mulf %109, %92 : vector<8x64xf32>
    %112 = arith.mulf %108, %107 : vector<8x64xf32>
    %113 = arith.addf %111, %112 : vector<8x64xf32>
    %114 = math.tanh %113 : vector<8x64xf32>
    %115 = arith.mulf %110, %114 : vector<8x64xf32>
    %c5_i32 = arith.constant 5 : i32
    %116 = arith.index_cast %c5_i32 : i32 to index
    %c0_32 = arith.constant 0 : index
    %c0_33 = arith.constant 0 : index
    %117 = vector.load %arg8[%116, %c0_32, %c0_33] : memref<8x8x256xf32, #tpu.memory_space<vmem>>, vector<1x8x256xf32>
    %118 = vector.shape_cast %117 : vector<1x8x256xf32> to vector<8x256xf32>
    %cst_34 = arith.constant dense<0.000000e+00> : vector<8x256xf32>
    %119 = tpu.matmul %115, %9, %cst_34 {dimension_numbers = #tpu.dot_dimension_numbers<[1], [0], [0], [1], [0, 0, 1, 1], [], []>} : vector<8x64xf32>, vector<64x256xf32>, vector<8x256xf32> -> vector<8x256xf32>
    %120 = arith.addf %118, %119 : vector<8x256xf32>
    %121 = vector.extract_strided_slice %120 {offsets = [0, 0], sizes = [8, 192], strides = [1, 1]} : vector<8x256xf32> to vector<8x192xf32>
    %122 = arith.negf %121 : vector<8x192xf32>
    %123 = math.exp %122 : vector<8x192xf32>
    %cst_35 = arith.constant 1.000000e+00 : f32
    %124 = vector.broadcast %cst_35 : f32 to vector<8x192xf32>
    %125 = arith.addf %124, %123 : vector<8x192xf32>
    %126 = arith.divf %124, %125 : vector<8x192xf32>
    %127 = vector.extract_strided_slice %120 {offsets = [0, 192], sizes = [8, 64], strides = [1, 1]} : vector<8x256xf32> to vector<8x64xf32>
    %128 = math.tanh %127 : vector<8x64xf32>
    %129 = vector.extract_strided_slice %126 {offsets = [0, 0], sizes = [8, 64], strides = [1, 1]} : vector<8x192xf32> to vector<8x64xf32>
    %130 = vector.extract_strided_slice %126 {offsets = [0, 64], sizes = [8, 64], strides = [1, 1]} : vector<8x192xf32> to vector<8x64xf32>
    %131 = vector.extract_strided_slice %126 {offsets = [0, 128], sizes = [8, 64], strides = [1, 1]} : vector<8x192xf32> to vector<8x64xf32>
    %132 = arith.mulf %130, %113 : vector<8x64xf32>
    %133 = arith.mulf %129, %128 : vector<8x64xf32>
    %134 = arith.addf %132, %133 : vector<8x64xf32>
    %135 = math.tanh %134 : vector<8x64xf32>
    %136 = arith.mulf %131, %135 : vector<8x64xf32>
    %c6_i32 = arith.constant 6 : i32
    %137 = arith.index_cast %c6_i32 : i32 to index
    %c0_36 = arith.constant 0 : index
    %c0_37 = arith.constant 0 : index
    %138 = vector.load %arg8[%137, %c0_36, %c0_37] : memref<8x8x256xf32, #tpu.memory_space<vmem>>, vector<1x8x256xf32>
    %139 = vector.shape_cast %138 : vector<1x8x256xf32> to vector<8x256xf32>
    %cst_38 = arith.constant dense<0.000000e+00> : vector<8x256xf32>
    %140 = tpu.matmul %136, %9, %cst_38 {dimension_numbers = #tpu.dot_dimension_numbers<[1], [0], [0], [1], [0, 0, 1, 1], [], []>} : vector<8x64xf32>, vector<64x256xf32>, vector<8x256xf32> -> vector<8x256xf32>
    %141 = arith.addf %139, %140 : vector<8x256xf32>
    %142 = vector.extract_strided_slice %141 {offsets = [0, 0], sizes = [8, 192], strides = [1, 1]} : vector<8x256xf32> to vector<8x192xf32>
    %143 = arith.negf %142 : vector<8x192xf32>
    %144 = math.exp %143 : vector<8x192xf32>
    %cst_39 = arith.constant 1.000000e+00 : f32
    %145 = vector.broadcast %cst_39 : f32 to vector<8x192xf32>
    %146 = arith.addf %145, %144 : vector<8x192xf32>
    %147 = arith.divf %145, %146 : vector<8x192xf32>
    %148 = vector.extract_strided_slice %141 {offsets = [0, 192], sizes = [8, 64], strides = [1, 1]} : vector<8x256xf32> to vector<8x64xf32>
    %149 = math.tanh %148 : vector<8x64xf32>
    %150 = vector.extract_strided_slice %147 {offsets = [0, 0], sizes = [8, 64], strides = [1, 1]} : vector<8x192xf32> to vector<8x64xf32>
    %151 = vector.extract_strided_slice %147 {offsets = [0, 64], sizes = [8, 64], strides = [1, 1]} : vector<8x192xf32> to vector<8x64xf32>
    %152 = vector.extract_strided_slice %147 {offsets = [0, 128], sizes = [8, 64], strides = [1, 1]} : vector<8x192xf32> to vector<8x64xf32>
    %153 = arith.mulf %151, %134 : vector<8x64xf32>
    %154 = arith.mulf %150, %149 : vector<8x64xf32>
    %155 = arith.addf %153, %154 : vector<8x64xf32>
    %156 = math.tanh %155 : vector<8x64xf32>
    %157 = arith.mulf %152, %156 : vector<8x64xf32>
    %c7_i32 = arith.constant 7 : i32
    %158 = arith.index_cast %c7_i32 : i32 to index
    %c0_40 = arith.constant 0 : index
    %c0_41 = arith.constant 0 : index
    %159 = vector.load %arg8[%158, %c0_40, %c0_41] : memref<8x8x256xf32, #tpu.memory_space<vmem>>, vector<1x8x256xf32>
    %160 = vector.shape_cast %159 : vector<1x8x256xf32> to vector<8x256xf32>
    %cst_42 = arith.constant dense<0.000000e+00> : vector<8x256xf32>
    %161 = tpu.matmul %157, %9, %cst_42 {dimension_numbers = #tpu.dot_dimension_numbers<[1], [0], [0], [1], [0, 0, 1, 1], [], []>} : vector<8x64xf32>, vector<64x256xf32>, vector<8x256xf32> -> vector<8x256xf32>
    %162 = arith.addf %160, %161 : vector<8x256xf32>
    %163 = vector.extract_strided_slice %162 {offsets = [0, 0], sizes = [8, 192], strides = [1, 1]} : vector<8x256xf32> to vector<8x192xf32>
    %164 = arith.negf %163 : vector<8x192xf32>
    %165 = math.exp %164 : vector<8x192xf32>
    %cst_43 = arith.constant 1.000000e+00 : f32
    %166 = vector.broadcast %cst_43 : f32 to vector<8x192xf32>
    %167 = arith.addf %166, %165 : vector<8x192xf32>
    %168 = arith.divf %166, %167 : vector<8x192xf32>
    %169 = vector.extract_strided_slice %162 {offsets = [0, 192], sizes = [8, 64], strides = [1, 1]} : vector<8x256xf32> to vector<8x64xf32>
    %170 = math.tanh %169 : vector<8x64xf32>
    %171 = vector.extract_strided_slice %168 {offsets = [0, 0], sizes = [8, 64], strides = [1, 1]} : vector<8x192xf32> to vector<8x64xf32>
    %172 = vector.extract_strided_slice %168 {offsets = [0, 64], sizes = [8, 64], strides = [1, 1]} : vector<8x192xf32> to vector<8x64xf32>
    %173 = vector.extract_strided_slice %168 {offsets = [0, 128], sizes = [8, 64], strides = [1, 1]} : vector<8x192xf32> to vector<8x64xf32>
    %174 = arith.mulf %172, %155 : vector<8x64xf32>
    %175 = arith.mulf %171, %170 : vector<8x64xf32>
    %176 = arith.addf %174, %175 : vector<8x64xf32>
    %177 = math.tanh %176 : vector<8x64xf32>
    %178 = arith.mulf %173, %177 : vector<8x64xf32>
    %c8_i32 = arith.constant 8 : i32
    %c0_44 = arith.constant 0 : index
    %c0_45 = arith.constant 0 : index
    %179 = vector.load %arg5[%c0_44, %c0_45] : memref<64x128xf32, #tpu.memory_space<vmem>>, vector<64x128xf32>
    %cst_46 = arith.constant dense<0.000000e+00> : vector<8x128xf32>
    %180 = tpu.matmul %178, %179, %cst_46 {dimension_numbers = #tpu.dot_dimension_numbers<[1], [0], [0], [1], [0, 0, 1, 1], [], []>} : vector<8x64xf32>, vector<64x128xf32>, vector<8x128xf32> -> vector<8x128xf32>
    %c0_47 = arith.constant 0 : index
    %c0_48 = arith.constant 0 : index
    %181 = vector.load %arg6[%c0_47, %c0_48] : memref<1x128xf32, #tpu.memory_space<vmem>>, vector<1x128xf32>
    %182 = vector.broadcast %181 : vector<1x128xf32> to vector<8x128xf32>
    %183 = arith.addf %180, %182 : vector<8x128xf32>
    %c0_49 = arith.constant 0 : index
    %c0_50 = arith.constant 0 : index
    %184 = vector.load %arg7[%c0_49, %c0_50] : memref<8x128xf32, #tpu.memory_space<vmem>>, vector<8x128xf32>
    tpu.vector_store %arg7[%c0_49, %c0_50], %183 {strides = array<i32>} : memref<8x128xf32, #tpu.memory_space<vmem>>, vector<8x128xf32>,
    return
  }
  func.func @transform_0(%arg0: i32) -> (i32, i32, i32) {
    %c0_i32 = arith.constant 0 : i32
    %c0_i32_0 = arith.constant 0 : i32
    %c0_i32_1 = arith.constant 0 : i32
    return %c0_i32, %arg0, %c0_i32_0 : i32, i32, i32
  }
  func.func @transform_1(%arg0: i32) -> (i32, i32) {
    %c0_i32 = arith.constant 0 : i32
    %c0_i32_0 = arith.constant 0 : i32
    %c0_i32_1 = arith.constant 0 : i32
    return %c0_i32, %c0_i32_0 : i32, i32
  }
  func.func @transform_2(%arg0: i32) -> (i32, i32) {
    %c0_i32 = arith.constant 0 : i32
    %c0_i32_0 = arith.constant 0 : i32
    %c0_i32_1 = arith.constant 0 : i32
    return %c0_i32, %c0_i32_0 : i32, i32
  }
  func.func @transform_3(%arg0: i32) -> (i32, i32) {
    %c0_i32 = arith.constant 0 : i32
    %c0_i32_0 = arith.constant 0 : i32
    %c0_i32_1 = arith.constant 0 : i32
    return %c0_i32, %c0_i32_0 : i32, i32
  }
  func.func @transform_4(%arg0: i32) -> (i32, i32) {
    %c0_i32 = arith.constant 0 : i32
    %c0_i32_0 = arith.constant 0 : i32
    %c0_i32_1 = arith.constant 0 : i32
    return %c0_i32, %c0_i32_0 : i32, i32
  }
  func.func @transform_5(%arg0: i32) -> (i32, i32) {
    %c0_i32 = arith.constant 0 : i32
    %c0_i32_0 = arith.constant 0 : i32
    %c0_i32_1 = arith.constant 0 : i32
    return %c0_i32, %c0_i32_0 : i32, i32
  }
  func.func @transform_6(%arg0: i32) -> (i32, i32) {
    %c0_i32 = arith.constant 0 : i32
    %c0_i32_0 = arith.constant 0 : i32
    return %arg0, %c0_i32 : i32, i32
  }
}

</mosaic_0001>

<bundles_post_ra>
// kernel: tpu_custom_call.1
= control target key start
LH: loop header
LB: loop body
LE: loop exit
PB: predicated region body
PF: predicated region fallthrough
CT: control target
= control target key end

     0   :  { %s2483_s0 = inlined_call_operand.hbm [shape: f32[8,16,64], index: 0, kind: input, shape index: {}]   ;;  %s2484_s1 = inlined_call_operand.hbm [shape: f32[64,256], index: 1, kind: input, shape index: {}]   ;;  %s2485_s2 = inlined_call_operand.hbm [shape: f32[1,256], index: 2, kind: input, shape index: {}]   ;;  %s2486_s3 = inlined_call_operand.hbm [shape: f32[64,256], index: 3, kind: input, shape index: {}]   ;;  %s2487_s4 = inlined_call_operand.hbm [shape: f32[64,128], index: 4, kind: input, shape index: {}]   ;;  %s2488_s5 = inlined_call_operand.vmem [shape: f32[1,128], index: 5, kind: input, shape index: {}]   ;;  %s2489_s6 = inlined_call_operand.hbm [shape: f32[16,128], index: 6, kind: output, shape index: {}]  }
   0x1   :  { %2493 = sst [smem:[#allocation17_spill]] %s2484_s1 }
   0x2   :  { %11 = vsyncpa [#allocation4], 0 }
   0x3   :  { %13 = vsyncpa [#allocation4 + $0x1], 0 }
   0x4   :  { %14 = vsyncpa [#allocation7], 0 }
   0x5   :  { %15 = vsyncpa [#allocation10], 0 }
   0x6   :  { %16 = vsyncpa [#allocation5], 0 }
   0x7   :  { %18 = vsyncpa [#allocation5 + $0x1], 0  ;;  %s2023_s21 = smov 0   ;;  %s2025_s22 = smov 0  }
   0x8   :  { %s2027_s23 = smov 0   ;;  %s2029_s24 = smov 0  }
   0x9 LB: > { %s2044_s25 = sadd.s32 4294967295, %s1976_s24   ;;  %s1495_s26 = sadd.s32 4294967294, %s1976_s24   ;;  %s1976_s24 = sphi %s2029_s24, %s2508_s24   ;;  %s1972_s23 = sphi %s2027_s23, %s2507_s23   ;;  %s1968_s22 = sphi %s2025_s22, %s2506_s22   ;;  %s1964_s21 = sphi %s2023_s21, %s2505_s21  }
   0xa   : > { %p44_p0 = scmp.ne.s32.totalorder %s1968_s22, %s1964_s21  ;;  %p45_p1 = scmp.eq.s32.totalorder %s2044_s25, 0 }
   0xb   : > { %p173_p2 = scmp.eq.s32.totalorder %s2044_s25, 1  ;;  %p179_p3 = scmp.eq.s32.totalorder %s1495_s26, 1 }
   0xc   : > { %p2053_p4 = por %p45_p1, %p44_p0  ;;  %p1496_p5 = scmp.ge.s32.totalorder %s1976_s24, 1 }
   0xd   : > { %p2058_p6 = por %p179_p3, %p44_p0  ;;  %p186_p7 = scmp.lt.s32.totalorder %s1976_s24, 3 }
   0xe   : > { %s2496_s1 = sld [smem:[#allocation17_spill]]  ;;  %s1978_s9 = smov [#allocation6]  }
   0xf   : > { %p2066_p8 = pnand %p1496_p5, %p186_p7  ;;  %s199_s10 = sshll.u32 %s1978_s9, 4  ;;  %s200_s10 = int_to_ptr.vmem [resolvable:$true] %s199_s10 }
  0x10   : > { %s223_s14 = sshll.u32 %s2486_s3, 4  ;;  %s2490_s15 = smov 256   ;;  %s224_s14 = int_to_ptr.hbm [resolvable:$true] %s223_s14 }
  0x11   : > { %p1582_p9 = pneg %p2066_p8  ;;  %s1980_s16 = smov 16  }
  0x12   : > { %s1981_s17 = smov [#allocation9]   ;;  %s212_s26 = sshll.u32 %s2485_s2, 4  ;;  %s213_s26 = int_to_ptr.hbm [resolvable:$true] %s212_s26 }
  0x13   : > { %p2074_p10 = pnand %p1582_p9, %p45_p1  ;;  %s225_s18 = sshll.u32 %s1981_s17, 4  ;;  %s226_s18 = int_to_ptr.vmem [resolvable:$true] %s225_s18 }
  0x14   : > { %s197_s7 = sshll.u32 %s2496_s1, 4  ;;  %s1982_s9 = smov [#allocation8]   ;;  %s198_s7 = int_to_ptr.hbm [resolvable:$true] %s197_s7 }
  0x15   : > { %1585 = dma.hbm_to_vmem [thread:$0]  (!%p2074_p10), %s198_s7, 2048, %s200_s10, [#allocation7], %s2490_s15, %s2490_s15, %s1980_s16  }
  0x16   : > { %1591 = dma.hbm_to_vmem [thread:$0]  (!%p2074_p10), %s224_s14, 2048, %s226_s18, [#allocation10], %s2490_s15, %s2490_s15, %s1980_s16  }
  0x17   : > { %s237_s7 = sshll.u32 %s2487_s4, 4  ;;  %s214_s10 = sshll.u32 %s1982_s9, 4  ;;  %s238_s7 = int_to_ptr.hbm [resolvable:$true] %s237_s7  ;;  %s215_s10 = int_to_ptr.vmem [resolvable:$true] %s214_s10 }
  0x18   : > { %1588 = dma.hbm_to_vmem [thread:$0]  (!%p2074_p10), %s213_s26, 32, %s215_s10, [#allocation7]  }
  0x19   : > { %s1983_s12 = smov [#allocation11]   ;;  %s2491_s14 = smov 128  }
  0x1a   : > { %s239_s13 = sshll.u32 %s1983_s12, 4  ;;  %s2492_s16 = smov 8   ;;  %s240_s13 = int_to_ptr.vmem [resolvable:$true] %s239_s13 }
  0x1b   : > { %1594 = dma.hbm_to_vmem [thread:$0]  (!%p2074_p10), %s238_s7, 1024, %s240_s13, [#allocation10], %s2491_s14, %s2491_s14, %s2492_s16  }
  0x1c   : > { %s2104_s17 = sadd.s32 1, %s1976_s24   ;;  %s31_s19 = sadd.s32 1, %s1972_s23 }
  0x1d   : > { %s28_s18 = ssub.s32 %s1976_s24, %s2104_s17  ;;  %p38_p13 = scmp.ne.s32.totalorder %s1972_s23, %s1968_s22 }
  0x1e   : > { %p29_p12 = scmp.eq.s32.totalorder %s28_s18, 0  ;;  %p39_p0 = scmp.eq.s32.totalorder %s1976_s24, 0 }
  0x1f   : > { %p2117_p5 = por %p173_p2, %p38_p13  ;;  %p1607_p7 = scmp.lt.s32.totalorder %s1976_s24, 2 }
  0x20   : > { %s2113_s20 = scalar_select %p29_p12, %s1972_s23, %s31_s19  }
  0x21   : > { %p40_p3 = por %p39_p0, %p38_p13  ;;  %s256_s11 = sand.u32 1, %s1972_s23  }
  0x22   : > { %s1502_s29 = sshll.u32 %s256_s11, 6  ;;  %s1503_s30 = sshll.u32 %s1976_s24, 3 }
  0x23   : > { %s264_s10 = scalar_lea.hbm %s2483_s0, %s1503_s30  ;;  %s260_s12 = scalar_lea.vmem [#allocation3], %s1502_s29 }
  0x24   : > { %s267_s13 = sshll.u32 %s260_s12, 4  ;;  %s265_s18 = sshll.u32 %s264_s10, 4  ;;  %s268_s13 = int_to_ptr.vmem [resolvable:$true] %s267_s13  ;;  %s266_s18 = int_to_ptr.hbm [resolvable:$true] %s265_s18 }
  0x25   : > { %p2127_p9 = pnand %p1607_p7, %p40_p3  ;;  %s257_s15 = scalar_lea.sflag [#allocation4], %s256_s11 }
  0x26   : > { %s1872_s14 = sshra.s32 %s266_s18, 4  ;;  %s1879_s7 = scalar_lea.hbm %s2483_s0, 128  ;;  %s1873_s14 = int_to_ptr.hbm [resolvable:$true] %s1872_s14 }
  0x27   : > { %s1874_s16 = scalar_lea.hbm %s1873_s14, 64  ;;  %p1876_p10 = pneg %p2127_p9 }
  0x28   : > { %p1875_p2 = scmp.ne.s32.totalorder %s1873_s14, %s1874_s16  ;;  %p1880_p0 = scmp.lt.s32.totalorder %s1873_s14, %s2483_s0 }
  0x29   : > { %p1881_p3 = scmp.lt.s32.totalorder %s1879_s7, %s1874_s16 }
  0x2a   : > { %p1877_p12 = pnand %p1876_p10, %p1875_p2 }
  0x2b   : > { %p1882_p7 = por %p1881_p3, %p1880_p0 }
  0x2c   : > { %p1878_p13 = pneg %p1877_p12 }
  0x2e   : > { %p1883_p11 = pnand %p1882_p7, %p1878_p13 }
  0x30   : > { %1886 = shalt.err (!%p1883_p11)
}
  0x31   : > { %s2501_s11 = smov 8   ;;  %s2502_s12 = smov 128  }
  0x32   : > { %s2503_s1 = smov 256   ;;  %279 = sbr.rel (%p2066_p8) target bundleno = 3995 (0xf9b), region = 44 }
  0x33   : > { %1598 = dma.hbm_to_vmem [thread:$0]  (!%p2127_p9), %s266_s18, 1024, %s268_s13, %s257_s15, %s2503_s1, %s2502_s12, %s2501_s11  }
  0x34   : > { %s2147_s30 = sand.u32 (!%p2066_p8), 1, %s1968_s22  }
  0x35   : > { %s1505_s14 = sshll.u32 (!%p2066_p8), %s2147_s30, 6  ;;  %s282_s16 = scalar_lea.sflag (!%p2066_p8), [#allocation4], %s2147_s30 }
  0x36   : > { %s2151_s29 = scalar_lea.vmem (!%p2066_p8), [#allocation3], %s1505_s14 }
  0x37   : > { %1947 = dma.done.wait (%p2053_p4), %s282_s16, 1024  }
  0x38   : > { %1949 = vsyncadd (%p2053_p4), %s282_s16, 4294966272 }
  0x39   : > { %1951 = dma.done.wait (%p45_p1), [#allocation7], 2080  }
  0x3a   : > { %1953 = vsyncadd (%p45_p1), [#allocation7], 4294965216 }
  0x3b   : > { %1955 = dma.done.wait (%p45_p1), [#allocation10], 3072  }
  0x3c   : > { %1957 = vsyncadd (%p45_p1), [#allocation10], 4294964224  ;;  %v2165_v0 = vld [vmem:[#allocation9 + $0x78] sm:$0xff]  ;;  %v2167_v1 = vld [vmem:[#allocation9 + $0x68] sm:$0xff]  ;;  %vm365_vm0 = vcmask 523264   ;;  %v1986_v28 = vmov 0.0  }
  0x3d   : > { %v358_v2 = vld [vmem:[#allocation6 + $0x78] sm:$0xff]  ;;  %537 = vmatpush.msra.mxu3 %v2165_v0  ;;  %v356_v3 = vld [vmem:[#allocation6 + $0x68] sm:$0xff]  ;;  %v357_v12 = vld [vmem:[#allocation6 + $0x70] sm:$0xff]  ;;  %s1987_s1 = smov 64   ;;  %s1510_s27 = sshll.u32 %s2147_s30, 3 }
  0x3e   : > { %439 = vmatpush.msra.mxu1 %v358_v2  ;;  %v2170_v4 = vld [vmem:[#allocation9 + $0x58] sm:$0xff]  ;;  %v2173_v6 = vld [vmem:[#allocation9 + $0x48] sm:$0xff]  ;;  %v2178_v9 = vld [vmem:[#allocation9 + $0x70] sm:$0xff]  ;;  %398 = vmatpush.msra.mxu0 %v357_v12  ;;  %s1559_s8 = sshll.u32 %s2044_s25, 3  ;;  %s334_s9 = scalar_lea.vmem [#allocation12], %s1510_s27 }
  0x3f   : > { %v354_v5 = vld [vmem:[#allocation6 + $0x58] sm:$0xff]  ;;  %538 = vmatpush.msra.mxu3 %v2167_v1  ;;  %v352_v7 = vld [vmem:[#allocation6 + $0x48] sm:$0xff]  ;;  %517 = vmatpush.msra.mxu2 %v2178_v9  ;;  %v355_v14 = vld [vmem:[#allocation6 + $0x60] sm:$0xff]  ;;  %s1382_s18 = scalar_lea.hbm %s2489_s6, %s1559_s8  ;;  %s1384_s10 = sshll.u32 %s334_s9, 4  ;;  %s1385_s10 = int_to_ptr.vmem [resolvable:$true] %s1384_s10 }
  0x40   : > { %440 = vmatpush.msra.mxu1 %v356_v3  ;;  %v2176_v8 = vld [vmem:[#allocation9 + $0x38] sm:$0xff]  ;;  %v2181_v11 = vld [vmem:[#allocation9 + $0x60] sm:$0xff]  ;;  %v2184_v13 = vld [vmem:[#allocation9 + $0x50] sm:$0xff]  ;;  %399 = vmatpush.msra.mxu0 %v355_v14  ;;  %s1386_s11 = sshll.u32 %s1382_s18, 4  ;;  %s1372_s12 = scalar_lea.sflag [#allocation5], %s2147_s30  ;;  %s1387_s11 = int_to_ptr.hbm [resolvable:$true] %s1386_s11 }
  0x41   : > { %539 = vmatpush.msra.mxu3 %v2170_v4  ;;  %v350_v10 = vld [vmem:[#allocation6 + $0x38] sm:$0xff]  ;;  %v2186_v15 = vld [vmem:[#allocation9 + $0x28] sm:$0xff]  ;;  %518 = vmatpush.msra.mxu2 %v2181_v11  ;;  %v2190_v17 = vld [vmem:[#allocation9 + $0x40] sm:$0xff]  ;;  %s1916_s14 = sshra.s32 %s1387_s11, 4  ;;  %s1917_s14 = int_to_ptr.hbm [resolvable:$true] %s1916_s14 }
  0x42   : > { %441 = vmatpush.msra.mxu1 %v354_v5  ;;  %v348_v16 = vld [vmem:[#allocation6 + $0x28] sm:$0xff]  ;;  %v353_v18 = vld [vmem:[#allocation6 + $0x50] sm:$0xff]  ;;  %v2192_v19 = vld [vmem:[#allocation9 + $0x18] sm:$0xff]  ;;  %s1918_s25 = scalar_lea.hbm %s1917_s14, 8  ;;  %p1923_p11 = scmp.lt.s32.totalorder %s1917_s14, %s2489_s6 }
  0x43   : > { %540 = vmatpush.msra.mxu3 %v2173_v6  ;;  %v346_v20 = vld [vmem:[#allocation6 + $0x18] sm:$0xff]  ;;  %519 = vmatpush.msra.mxu2 %v2184_v13  ;;  %v351_v22 = vld [vmem:[#allocation6 + $0x40] sm:$0xff]  ;;  %v2198_v23 = vld [vmem:[#allocation9 + $0x8] sm:$0xff]  ;;  %p1919_p1 = scmp.ne.s32.totalorder %s1917_s14, %s1918_s25 }
  0x44   : > { %442 = vmatpush.msra.mxu1 %v352_v7  ;;  %v2196_v21 = vld [vmem:[#allocation9 + $0x30] sm:$0xff]  ;;  %v344_v24 = vld [vmem:[#allocation6 + $0x8] sm:$0xff]  ;;  %400 = vmatpush.msra.mxu0 %v353_v18  ;;  %v335_v25 = vld [vmem:[%s2151_s29] sm:$0xff] }
  0x45   : > { %541 = vmatpush.msra.mxu3 %v2176_v8  ;;  %520 = vmatpush.msra.mxu2 %v2190_v17  ;;  %v2204_v26 = vld [vmem:[#allocation9 + $0x20] sm:$0xff]  ;;  %v349_v27 = vld [vmem:[#allocation6 + $0x30] sm:$0xff]  ;;  %v359_v34 = vld [vmem:[#allocation8] sm:$0x3]  ;;  %p1920_p4 = pnand %p1919_p1, %p2117_p5 }
  0x46   : > { %443 = vmatpush.msra.mxu1 %v350_v10  ;;  %401 = vmatpush.msra.mxu0 %v351_v22  ;;  %v2208_v29 = vld [vmem:[#allocation9 + $0x10] sm:$0xff]  ;;  %v347_v30 = vld [vmem:[#allocation6 + $0x20] sm:$0xff]  ;;  %v2280_v35 = vperm.slane %v359_v34, 1  ;;  %v2284_v41 = vperm.slane %v359_v34, 0  ;;  %v336_v10 = vld [vmem:[%s2151_s29 + $0x8] sm:$0xff] }
  0x47   : > { %542 = vmatpush.msra.mxu3 %v2186_v15  ;;  %521 = vmatpush.msra.mxu2 %v2196_v21  ;;  %v2211_v31 = vld [vmem:[#allocation9] sm:$0xff]  ;;  %v345_v32 = vld [vmem:[#allocation6 + $0x10] sm:$0xff]  ;;  %p1921_p8 = pneg %p1920_p4 }
  0x48   : > { %444 = vmatpush.msra.mxu1 %v348_v16  ;;  %402 = vmatpush.msra.mxu0 %v349_v27  ;;  %v343_v33 = vld [vmem:[#allocation6] sm:$0xff] }
  0x49   : > { %543 = vmatpush.msra.mxu3 %v2192_v19  ;;  %522 = vmatpush.msra.mxu2 %v2204_v26 }
  0x4a   : > { %445 = vmatpush.msra.mxu1 %v346_v20  ;;  %403 = vmatpush.msra.mxu0 %v347_v30 }
  0x4b   : > { %544 = vmatpush.msra.mxu3 %v2198_v23  ;;  %523 = vmatpush.msra.mxu2 %v2208_v29 }
  0x4c   : > { %446 = vmatpush.msra.mxu1 %v344_v24  ;;  %545 = vmatmul.f32.vlgmr.msra.gmra.mxu3 %v1986_v28 }
  0x4d   : > { %1519 = vmatmul.msk.f32.vlgmr.msra.gmra.mxu1 %vm365_vm0, %v335_v25  ;;  %641 = vmatpush.msrb.mxu3 %v2165_v0 }
  0x4e   : > { %953 = vmatpush.msrb.mxu1 %v2165_v0  ;;  %524 = vmatpush.msra.mxu2 %v2211_v31 }
  0x4f   : > { %642 = vmatpush.msrb.mxu3 %v2167_v1  ;;  %404 = vmatpush.msra.mxu0 %v345_v32 }
  0x50   : > { %954 = vmatpush.msrb.mxu1 %v2167_v1  ;;  %525 = vmatmul.f32.vlgmr.msra.gmra.mxu2 %v1986_v28 }
  0x51   : > { %643 = vmatpush.msrb.mxu3 %v2170_v4  ;;  %405 = vmatpush.msra.mxu0 %v343_v33 }
  0x52   : > { %621 = vmatpush.msrb.mxu2 %v2178_v9  ;;  %1511 = vmatmul.msk.f32.vlgmr.msra.gmra.mxu0 %vm365_vm0, %v335_v25 }
  0x53   : > { %644 = vmatpush.msrb.mxu3 %v2173_v6  ;;  %955 = vmatpush.msrb.mxu1 %v2170_v4 }
  0x54   : > { %622 = vmatpush.msrb.mxu2 %v2181_v11  ;;  %933 = vmatpush.msrb.mxu0 %v2178_v9 }
  0x55   : > { %645 = vmatpush.msrb.mxu3 %v2176_v8  ;;  %956 = vmatpush.msrb.mxu1 %v2173_v6 }
  0x56   : > { %623 = vmatpush.msrb.mxu2 %v2184_v13  ;;  %934 = vmatpush.msrb.mxu0 %v2181_v11 }
  0x57   : > { %646 = vmatpush.msrb.mxu3 %v2186_v15  ;;  %957 = vmatpush.msrb.mxu1 %v2176_v8 }
  0x58   : > { %624 = vmatpush.msrb.mxu2 %v2190_v17  ;;  %935 = vmatpush.msrb.mxu0 %v2184_v13 }
  0x59   : > { %647 = vmatpush.msrb.mxu3 %v2192_v19  ;;  %958 = vmatpush.msrb.mxu1 %v2186_v15 }
  0x5a   : > { %625 = vmatpush.msrb.mxu2 %v2196_v21  ;;  %936 = vmatpush.msrb.mxu0 %v2190_v17 }
  0x5b   : > { %648 = vmatpush.msrb.mxu3 %v2198_v23  ;;  %959 = vmatpush.msrb.mxu1 %v2192_v19 }
  0x5c   : > { %626 = vmatpush.msrb.mxu2 %v2204_v26  ;;  %937 = vmatpush.msrb.mxu0 %v2196_v21 }
  0x5d   : > { %745 = vmatpush.msra.mxu3 %v2165_v0  ;;  %960 = vmatpush.msrb.mxu1 %v2198_v23 }
  0x5e   : > { %627 = vmatpush.msrb.mxu2 %v2208_v29  ;;  %938 = vmatpush.msrb.mxu0 %v2204_v26 }
  0x5f   : > { %746 = vmatpush.msra.mxu3 %v2167_v1  ;;  %1161 = vmatpush.msra.mxu1 %v2165_v0 }
  0x60   : > { %628 = vmatpush.msrb.mxu2 %v2211_v31  ;;  %939 = vmatpush.msrb.mxu0 %v2208_v29 }
  0x61   : > { %747 = vmatpush.msra.mxu3 %v2170_v4  ;;  %1162 = vmatpush.msra.mxu1 %v2167_v1 }
  0x62   : > { %725 = vmatpush.msra.mxu2 %v2178_v9  ;;  %940 = vmatpush.msrb.mxu0 %v2211_v31 }
  0x63   : > { %748 = vmatpush.msra.mxu3 %v2173_v6  ;;  %1163 = vmatpush.msra.mxu1 %v2170_v4 }
  0x64   : > { %726 = vmatpush.msra.mxu2 %v2181_v11  ;;  %1141 = vmatpush.msra.mxu0 %v2178_v9 }
  0x65   : > { %749 = vmatpush.msra.mxu3 %v2176_v8  ;;  %1164 = vmatpush.msra.mxu1 %v2173_v6 }
  0x66   : > { %727 = vmatpush.msra.mxu2 %v2184_v13  ;;  %1142 = vmatpush.msra.mxu0 %v2181_v11 }
  0x67   : > { %750 = vmatpush.msra.mxu3 %v2186_v15  ;;  %1165 = vmatpush.msra.mxu1 %v2176_v8 }
  0x68   : > { %728 = vmatpush.msra.mxu2 %v2190_v17  ;;  %1143 = vmatpush.msra.mxu0 %v2184_v13 }
  0x69   : > { %751 = vmatpush.msra.mxu3 %v2192_v19  ;;  %1166 = vmatpush.msra.mxu1 %v2186_v15 }
  0x6a   : > { %729 = vmatpush.msra.mxu2 %v2196_v21  ;;  %1144 = vmatpush.msra.mxu0 %v2190_v17 }
  0x6b   : > { %752 = vmatpush.msra.mxu3 %v2198_v23  ;;  %1167 = vmatpush.msra.mxu1 %v2192_v19 }
  0x6c   : > { %730 = vmatpush.msra.mxu2 %v2204_v26  ;;  %1145 = vmatpush.msra.mxu0 %v2196_v21 }
  0x6d   : > { %1168 = vmatpush.msra.mxu1 %v2198_v23  ;;  %1512 = vmatmul.msk.f32.gmra.mxu0 %vm365_vm0, %v336_v10 }
  0x6e   : > { %731 = vmatpush.msra.mxu2 %v2208_v29  ;;  %1146 = vmatpush.msra.mxu0 %v2204_v26 }
  0x6f   : > { %1520 = vmatmul.msk.f32.gmra.mxu1 %vm365_vm0, %v336_v10 }
  0x70   : > { %732 = vmatpush.msra.mxu2 %v2211_v31  ;;  %1147 = vmatpush.msra.mxu0 %v2208_v29 }
  0x72   : > { %1148 = vmatpush.msra.mxu0 %v2211_v31 }
  0xca   : > { %v448_v36 = vpop.f32.mrf.mxu1 }
  0xcb   : > { %v449_v37 = vadd.f32 %v448_v36, %v2280_v35 }
  0xcf   : > { %v546_v38 = vpop.f32.mrf.mxu3  ;;  %v407_v42 = vpop.f32.mrf.mxu0 }
  0xd0   : > { %v550_v39 = vadd.f32 %v546_v38, %v449_v37  ;;  %v408_v43 = vadd.f32 %v407_v42, %v2284_v41 }
  0xd2   : > { %1656 = vtanh.f32 %v550_v39  ;;  %v1528_v3 = vmul.f32 -1.442695, %v550_v39 }
  0xd3   : > { %v526_v44 = vpop.f32.mrf.mxu2 }
  0xd4   : > { %v549_v45 = vadd.f32 %v526_v44, %v408_v43 }
  0xd6   : > { %v1527_v46 = vmul.f32 -1.442695, %v549_v45 }
  0xd8   : > { %v1657_v40 = vpop.eup %1656  ;;  %1658 = vpow2.f32 %v1527_v46 }
  0xd9   : > { %592 = vrot.lane.b32.xlu0 %v1657_v40, %s1987_s1 }
  0xde   : > { %v1659_v47 = vpop.eup %1658 }
  0xdf   : > { %v557_v48 = vadd.f32 1.0, %v1659_v47 }
  0xe1   : > { %1660 = vrcp.f32 %v557_v48  ;;  %vm564_vm1 = vweird.f32 %v557_v48  ;;  %v570_v53 = vand.u32 2147483648, %v557_v48  ;;  %v568_v55 = vand.u32 2147483647, %v557_v48 }
  0xe3   : > { %v571_v56 = vor.u32 1.1754944e-38, %v570_v53  ;;  %vm569_vm4 = vcmp.eq.f32.partialorder %v568_v55, 8.507059e+37 }
  0xe7   : > { %v1661_v49 = vpop.eup %1660 }
  0xe8   : > { %v560_v50 = vmul.f32 %v1661_v49, %v557_v48  ;;  %vm565_vm2 = vweird.f32 %v1661_v49 }
  0xe9   : > { %vm566_vm3 = vmor %vm564_vm1, %vm565_vm2 }
  0xea   : > { %v561_v51 = vsub.f32 1.0, %v560_v50  ;;  %v410_v39 = vpop.f32.mrf.mxu0 }
  0xeb   : > { %v411_v40 = vadd.f32 %v410_v39, %v2284_v41 }
  0xec   : > { %v562_v52 = vmul.f32 %v1661_v49, %v561_v51  ;;  %v451_v33 = vpop.f32.mrf.mxu1 }
  0xed   : > { %v452_v34 = vadd.f32 %v451_v33, %v2280_v35 }
  0xee   : > { %v563_v54 = vadd.f32 %v1661_v49, %v562_v52 }
  0xf0   : > { %v567_v57 = vsel %vm566_vm3, %v1661_v49, %v563_v54 }
  0xf1   : > { %v572_v59 = vsel %vm569_vm4, %v571_v56, %v567_v57 }
  0xf2   : > { %v590_v61 = vmul.f32 0.0, %v572_v59 }
 0x14b   : > { %v593_v58 = vpop.permute.xlu0 %592 }
 0x14c   : > { %v595_v60 = vmul.f32 %v593_v58, %v572_v59 }
 0x14e   : > { %597 = vrot.lane.b32.xlu0 %v595_v60, %s1987_s1 }
 0x1c0   : > { %v598_v62 = vpop.permute.xlu0 %597 }
 0x1c1   : > { %v2288_v63 = vadd.f32 %v598_v62, %v590_v61 }
 0x1c3   : > { %1662 = vtanh.f32 %v2288_v63 }
 0x1c4   : > { %1664 = vpow2.f32 %v1528_v3 }
 0x1c9   : > { %v1663_v2 = vpop.eup %1662 }
 0x1ca   : > { %603 = vrot.lane.b32.xlu1 %v1663_v2, %s1987_s1  ;;  %v1665_v5 = vpop.eup %1664 }
 0x1cb   : > { %v558_v7 = vadd.f32 1.0, %v1665_v5 }
 0x1cd   : > { %1666 = vrcp.f32 %v558_v7  ;;  %v585_v22 = vand.u32 2147483648, %v558_v7  ;;  %vm579_vm6 = vweird.f32 %v558_v7  ;;  %v583_v24 = vand.u32 2147483647, %v558_v7 }
 0x1cf   : > { %v586_v27 = vor.u32 1.1754944e-38, %v585_v22  ;;  %vm584_vm8 = vcmp.eq.f32.partialorder %v583_v24, 8.507059e+37 }
 0x1d3   : > { %v1667_v12 = vpop.eup %1666 }
 0x1d4   : > { %v575_v14 = vmul.f32 %v1667_v12, %v558_v7  ;;  %vm580_vm5 = vweird.f32 %v1667_v12  ;;  %v337_v7 = vld [vmem:[%s2151_s29 + $0x10] sm:$0xff] }
 0x1d5   : > { %vm581_vm7 = vmor %vm579_vm6, %vm580_vm5  ;;  %1513 = vmatmul.msk.f32.gmra.mxu0 %vm365_vm0, %v337_v7  ;;  %1521 = vmatmul.msk.f32.gmra.mxu1 %vm365_vm0, %v337_v7 }
 0x1d6   : > { %v576_v16 = vsub.f32 1.0, %v575_v14 }
 0x1d8   : > { %v577_v18 = vmul.f32 %v1667_v12, %v576_v16 }
 0x1da   : > { %v578_v20 = vadd.f32 %v1667_v12, %v577_v18 }
 0x1dc   : > { %v582_v25 = vsel %vm581_vm7, %v1667_v12, %v578_v20 }
 0x1dd   : > { %v587_v28 = vsel %vm584_vm8, %v586_v27, %v582_v25 }
 0x23c   : > { %v604_v30 = vpop.permute.xlu1 %603 }
 0x23d   : > { %v606_v32 = vmul.f32 %v604_v30, %v587_v28 }
 0x23f   : > { %1529 = vmatmul.msk.f32.vlgmr.msrb.gmra.mxu2 %vm365_vm0, %v606_v32  ;;  %1530 = vmatmul.msk.f32.vlgmr.msrb.gmra.mxu3 %vm365_vm0, %v606_v32 }
 0x240   : > { %829 = vmatpush.msrb.mxu2 %v2178_v9  ;;  %849 = vmatpush.msrb.mxu3 %v2165_v0 }
 0x242   : > { %830 = vmatpush.msrb.mxu2 %v2181_v11  ;;  %850 = vmatpush.msrb.mxu3 %v2167_v1 }
 0x244   : > { %831 = vmatpush.msrb.mxu2 %v2184_v13  ;;  %851 = vmatpush.msrb.mxu3 %v2170_v4 }
 0x246   : > { %832 = vmatpush.msrb.mxu2 %v2190_v17  ;;  %852 = vmatpush.msrb.mxu3 %v2173_v6 }
 0x248   : > { %833 = vmatpush.msrb.mxu2 %v2196_v21  ;;  %853 = vmatpush.msrb.mxu3 %v2176_v8 }
 0x24a   : > { %834 = vmatpush.msrb.mxu2 %v2204_v26  ;;  %854 = vmatpush.msrb.mxu3 %v2186_v15 }
 0x24c   : > { %835 = vmatpush.msrb.mxu2 %v2208_v29  ;;  %855 = vmatpush.msrb.mxu3 %v2192_v19 }
 0x24e   : > { %836 = vmatpush.msrb.mxu2 %v2211_v31  ;;  %856 = vmatpush.msrb.mxu3 %v2198_v23 }
 0x252   : > { %v454_v30 = vpop.f32.mrf.mxu1 }
 0x253   : > { %v455_v32 = vadd.f32 %v454_v30, %v2280_v35 }
 0x2c2   : > { %v650_v36 = vpop.f32.mrf.mxu3  ;;  %v630_v42 = vpop.f32.mrf.mxu2 }
 0x2c3   : > { %v654_v37 = vadd.f32 %v650_v36, %v452_v34  ;;  %v653_v43 = vadd.f32 %v630_v42, %v411_v40 }
 0x2c5   : > { %1668 = vtanh.f32 %v654_v37  ;;  %v1531_v44 = vmul.f32 -1.442695, %v653_v43  ;;  %v1532_v2 = vmul.f32 -1.442695, %v654_v37  ;;  %v413_v37 = vpop.f32.mrf.mxu0 }
 0x2c7   : > { %1670 = vpow2.f32 %v1531_v44 }
 0x2cb   : > { %v1669_v38 = vpop.eup %1668 }
 0x2cc   : > { %696 = vrot.lane.b32.xlu1 %v1669_v38, %s1987_s1  ;;  %v414_v38 = vadd.f32 %v413_v37, %v2284_v41 }
 0x2cd   : > { %v1671_v45 = vpop.eup %1670 }
 0x2ce   : > { %v661_v46 = vadd.f32 1.0, %v1671_v45 }
 0x2d0   : > { %1672 = vrcp.f32 %v661_v46  ;;  %v674_v52 = vand.u32 2147483648, %v661_v46  ;;  %vm668_vm10 = vweird.f32 %v661_v46  ;;  %v672_v53 = vand.u32 2147483647, %v661_v46 }
 0x2d2   : > { %v675_v55 = vor.u32 1.1754944e-38, %v674_v52  ;;  %vm673_vm12 = vcmp.eq.f32.partialorder %v672_v53, 8.507059e+37 }
 0x2d6   : > { %v1673_v47 = vpop.eup %1672 }
 0x2d7   : > { %v664_v48 = vmul.f32 %v1673_v47, %v661_v46  ;;  %vm669_vm9 = vweird.f32 %v1673_v47 }
 0x2d8   : > { %vm670_vm11 = vmor %vm668_vm10, %vm669_vm9 }
 0x2d9   : > { %v665_v49 = vsub.f32 1.0, %v664_v48 }
 0x2db   : > { %v666_v50 = vmul.f32 %v1673_v47, %v665_v49 }
 0x2dd   : > { %v667_v51 = vadd.f32 %v1673_v47, %v666_v50 }
 0x2df   : > { %v671_v54 = vsel %vm670_vm11, %v1673_v47, %v667_v51 }
 0x2e0   : > { %v676_v57 = vsel %vm673_vm12, %v675_v55, %v671_v54 }
 0x2e1   : > { %v694_v59 = vmul.f32 %v676_v57, %v2288_v63 }
 0x33e   : > { %v697_v56 = vpop.permute.xlu1 %696 }
 0x33f   : > { %v699_v58 = vmul.f32 %v697_v56, %v676_v57 }
 0x341   : > { %701 = vrot.lane.b32.xlu2 %v699_v58, %s1987_s1 }
 0x39b   : > { %v702_v60 = vpop.permute.xlu2 %701 }
 0x39c   : > { %v2318_v61 = vadd.f32 %v702_v60, %v694_v59 }
 0x39e   : > { %1674 = vtanh.f32 %v2318_v61 }
 0x39f   : > { %1676 = vpow2.f32 %v1532_v2 }
 0x3a4   : > { %v1675_v62 = vpop.eup %1674 }
 0x3a5   : > { %707 = vrot.lane.b32.xlu2 %v1675_v62, %s1987_s1  ;;  %v1677_v3 = vpop.eup %1676 }
 0x3a6   : > { %v662_v5 = vadd.f32 1.0, %v1677_v3 }
 0x3a8   : > { %1678 = vrcp.f32 %v662_v5  ;;  %v689_v18 = vand.u32 2147483648, %v662_v5  ;;  %vm683_vm14 = vweird.f32 %v662_v5  ;;  %v687_v20 = vand.u32 2147483647, %v662_v5 }
 0x3aa   : > { %v690_v24 = vor.u32 1.1754944e-38, %v689_v18  ;;  %vm688_vm1 = vcmp.eq.f32.partialorder %v687_v20, 8.507059e+37 }
 0x3ae   : > { %v1679_v10 = vpop.eup %1678 }
 0x3af   : > { %v679_v63 = vmul.f32 %v1679_v10, %v662_v5  ;;  %vm684_vm13 = vweird.f32 %v1679_v10  ;;  %v338_v5 = vld [vmem:[%s2151_s29 + $0x18] sm:$0xff] }
 0x3b0   : > { %vm685_vm15 = vmor %vm683_vm14, %vm684_vm13  ;;  %1514 = vmatmul.msk.f32.gmra.mxu0 %vm365_vm0, %v338_v5  ;;  %1522 = vmatmul.msk.f32.gmra.mxu1 %vm365_vm0, %v338_v5 }
 0x3b1   : > { %v680_v12 = vsub.f32 1.0, %v679_v63 }
 0x3b3   : > { %v681_v14 = vmul.f32 %v1679_v10, %v680_v12 }
 0x3b5   : > { %v682_v16 = vadd.f32 %v1679_v10, %v681_v14 }
 0x3b7   : > { %v686_v22 = vsel %vm685_vm15, %v1679_v10, %v682_v16 }
 0x3b8   : > { %v691_v25 = vsel %vm688_vm1, %v690_v24, %v686_v22 }
 0x3ff   : > { %v708_v27 = vpop.permute.xlu2 %707 }
 0x400   : > { %v710_v28 = vmul.f32 %v708_v27, %v691_v25 }
 0x402   : > { %1533 = vmatmul.msk.f32.vlgmr.msra.gmra.mxu2 %vm365_vm0, %v710_v28  ;;  %1534 = vmatmul.msk.f32.vlgmr.msra.gmra.mxu3 %vm365_vm0, %v710_v28 }
 0x403   : > { %1037 = vmatpush.msra.mxu2 %v2178_v9  ;;  %1057 = vmatpush.msra.mxu3 %v2165_v0 }
 0x405   : > { %1038 = vmatpush.msra.mxu2 %v2181_v11  ;;  %1058 = vmatpush.msra.mxu3 %v2167_v1 }
 0x407   : > { %1039 = vmatpush.msra.mxu2 %v2184_v13  ;;  %1059 = vmatpush.msra.mxu3 %v2170_v4 }
 0x409   : > { %1040 = vmatpush.msra.mxu2 %v2190_v17  ;;  %1060 = vmatpush.msra.mxu3 %v2173_v6 }
 0x40b   : > { %1041 = vmatpush.msra.mxu2 %v2196_v21  ;;  %1061 = vmatpush.msra.mxu3 %v2176_v8 }
 0x40d   : > { %1042 = vmatpush.msra.mxu2 %v2204_v26  ;;  %1062 = vmatpush.msra.mxu3 %v2186_v15 }
 0x40f   : > { %1043 = vmatpush.msra.mxu2 %v2208_v29  ;;  %1063 = vmatpush.msra.mxu3 %v2192_v19 }
 0x411   : > { %1044 = vmatpush.msra.mxu2 %v2211_v31  ;;  %1064 = vmatpush.msra.mxu3 %v2198_v23 }
 0x485   : > { %v754_v33 = vpop.f32.mrf.mxu3  ;;  %v734_v39 = vpop.f32.mrf.mxu2 }
 0x486   : > { %v758_v34 = vadd.f32 %v754_v33, %v455_v32  ;;  %v757_v40 = vadd.f32 %v734_v39, %v414_v38  ;;  %v339_v38 = vld [vmem:[%s2151_s29 + $0x20] sm:$0xff]  ;;  %v340_v39 = vld [vmem:[%s2151_s29 + $0x28] sm:$0xff] }
 0x487   : > { %1515 = vmatmul.msk.f32.gmra.mxu0 %vm365_vm0, %v339_v38  ;;  %1523 = vmatmul.msk.f32.gmra.mxu1 %vm365_vm0, %v339_v38 }
 0x488   : > { %1680 = vtanh.f32 %v758_v34  ;;  %v1535_v42 = vmul.f32 -1.442695, %v757_v40  ;;  %v1536_v62 = vmul.f32 -1.442695, %v758_v34  ;;  %v341_v40 = vld [vmem:[%s2151_s29 + $0x30] sm:$0xff] }
 0x48a   : > { %1682 = vpow2.f32 %v1535_v42 }
 0x48e   : > { %v1681_v36 = vpop.eup %1680 }
 0x48f   : > { %800 = vrot.lane.b32.xlu0 %v1681_v36, %s1987_s1  ;;  %1516 = vmatmul.msk.f32.gmra.mxu0 %vm365_vm0, %v340_v39 }
 0x490   : > { %v1683_v43 = vpop.eup %1682  ;;  %1524 = vmatmul.msk.f32.gmra.mxu1 %vm365_vm0, %v340_v39 }
 0x491   : > { %v765_v44 = vadd.f32 1.0, %v1683_v43 }
 0x493   : > { %1684 = vrcp.f32 %v765_v44  ;;  %v778_v50 = vand.u32 2147483648, %v765_v44  ;;  %vm772_vm3 = vweird.f32 %v765_v44  ;;  %v776_v51 = vand.u32 2147483647, %v765_v44 }
 0x495   : > { %v779_v53 = vor.u32 1.1754944e-38, %v778_v50  ;;  %vm777_vm5 = vcmp.eq.f32.partialorder %v776_v51, 8.507059e+37 }
 0x497   : > { %1517 = vmatmul.msk.f32.gmra.mxu0 %vm365_vm0, %v341_v40 }
 0x498   : > { %1525 = vmatmul.msk.f32.gmra.mxu1 %vm365_vm0, %v341_v40 }
 0x499   : > { %v1685_v45 = vpop.eup %1684 }
 0x49a   : > { %v768_v46 = vmul.f32 %v1685_v45, %v765_v44  ;;  %vm773_vm2 = vweird.f32 %v1685_v45  ;;  %v342_v44 = vld [vmem:[%s2151_s29 + $0x38] sm:$0xff] }
 0x49b   : > { %vm774_vm4 = vmor %vm772_vm3, %vm773_vm2 }
 0x49c   : > { %v769_v47 = vsub.f32 1.0, %v768_v46 }
 0x49e   : > { %v770_v48 = vmul.f32 %v1685_v45, %v769_v47 }
 0x49f   : > { %1518 = vmatmul.msk.f32.gmra.mxu0 %vm365_vm0, %v342_v44 }
 0x4a0   : > { %v771_v49 = vadd.f32 %v1685_v45, %v770_v48  ;;  %1526 = vmatmul.msk.f32.gmra.mxu1 %vm365_vm0, %v342_v44 }
 0x4a2   : > { %v775_v52 = vsel %vm774_vm4, %v1685_v45, %v771_v49 }
 0x4a3   : > { %v780_v55 = vsel %vm777_vm5, %v779_v53, %v775_v52 }
 0x4a4   : > { %v798_v57 = vmul.f32 %v780_v55, %v2318_v61 }
 0x501   : > { %v801_v54 = vpop.permute.xlu0 %800 }
 0x502   : > { %v803_v56 = vmul.f32 %v801_v54, %v780_v55 }
 0x504   : > { %805 = vrot.lane.b32.xlu1 %v803_v56, %s1987_s1 }
 0x576   : > { %v806_v58 = vpop.permute.xlu1 %805 }
 0x577   : > { %v2348_v59 = vadd.f32 %v806_v58, %v798_v57 }
 0x579   : > { %1686 = vtanh.f32 %v2348_v59 }
 0x57a   : > { %1688 = vpow2.f32 %v1536_v62 }
 0x57f   : > { %v1687_v60 = vpop.eup %1686 }
 0x580   : > { %811 = vrot.lane.b32.xlu2 %v1687_v60, %s1987_s1  ;;  %v1689_v2 = vpop.eup %1688 }
 0x581   : > { %v766_v3 = vadd.f32 1.0, %v1689_v2 }
 0x583   : > { %1690 = vrcp.f32 %v766_v3  ;;  %v793_v14 = vand.u32 2147483648, %v766_v3  ;;  %vm787_vm7 = vweird.f32 %v766_v3  ;;  %v791_v16 = vand.u32 2147483647, %v766_v3 }
 0x585   : > { %v794_v20 = vor.u32 1.1754944e-38, %v793_v14  ;;  %vm792_vm9 = vcmp.eq.f32.partialorder %v791_v16, 8.507059e+37 }
 0x589   : > { %v1691_v7 = vpop.eup %1690 }
 0x58a   : > { %v783_v61 = vmul.f32 %v1691_v7, %v766_v3  ;;  %vm788_vm6 = vweird.f32 %v1691_v7 }
 0x58b   : > { %vm789_vm8 = vmor %vm787_vm7, %vm788_vm6 }
 0x58c   : > { %v784_v10 = vsub.f32 1.0, %v783_v61 }
 0x58e   : > { %v785_v63 = vmul.f32 %v1691_v7, %v784_v10 }
 0x590   : > { %v786_v12 = vadd.f32 %v1691_v7, %v785_v63 }
 0x592   : > { %v790_v18 = vsel %vm789_vm8, %v1691_v7, %v786_v12 }
 0x593   : > { %v795_v22 = vsel %vm792_vm9, %v794_v20, %v790_v18 }
 0x5da   : > { %v812_v24 = vpop.permute.xlu2 %811 }
 0x5db   : > { %v814_v25 = vmul.f32 %v812_v24, %v795_v22 }
 0x5dd   : > { %1537 = vmatmul.msk.f32.vlgmr.msrb.gmra.mxu2 %vm365_vm0, %v814_v25  ;;  %1538 = vmatmul.msk.f32.vlgmr.msrb.gmra.mxu3 %vm365_vm0, %v814_v25 }
 0x5de   : > { %1245 = vmatpush.msrb.mxu2 %v2178_v9  ;;  %1265 = vmatpush.msrb.mxu3 %v2165_v0  ;;  %v457_v0 = vpop.f32.mrf.mxu1 }
 0x5e0   : > { %1246 = vmatpush.msrb.mxu2 %v2181_v11  ;;  %1266 = vmatpush.msrb.mxu3 %v2167_v1  ;;  %v458_v1 = vadd.f32 %v457_v0, %v2280_v35 }
 0x5e2   : > { %1247 = vmatpush.msrb.mxu2 %v2184_v13  ;;  %1267 = vmatpush.msrb.mxu3 %v2170_v4 }
 0x5e4   : > { %1248 = vmatpush.msrb.mxu2 %v2190_v17  ;;  %1268 = vmatpush.msrb.mxu3 %v2173_v6 }
 0x5e6   : > { %1249 = vmatpush.msrb.mxu2 %v2196_v21  ;;  %1269 = vmatpush.msrb.mxu3 %v2176_v8  ;;  %v416_v8 = vpop.f32.mrf.mxu0  ;;  %v460_v2 = vpop.f32.mrf.mxu1 }
 0x5e7   : > { %v417_v11 = vadd.f32 %v416_v8, %v2284_v41  ;;  %v461_v61 = vadd.f32 %v460_v2, %v2280_v35 }
 0x5e8   : > { %1250 = vmatpush.msrb.mxu2 %v2204_v26  ;;  %1270 = vmatpush.msrb.mxu3 %v2186_v15 }
 0x5ea   : > { %1251 = vmatpush.msrb.mxu2 %v2208_v29  ;;  %1271 = vmatpush.msrb.mxu3 %v2192_v19 }
 0x5ec   : > { %1252 = vmatpush.msrb.mxu2 %v2211_v31  ;;  %1272 = vmatpush.msrb.mxu3 %v2198_v23 }
 0x5ee   : > { %v2396_v3 = vpop.f32.mrf.mxu1  ;;  %v419_v14 = vpop.f32.mrf.mxu0 }
 0x5ef   : > { %v420_v22 = vadd.f32 %v419_v14, %v2284_v41 }
 0x5f6   : > { %v2398_v5 = vpop.f32.mrf.mxu1  ;;  %v2404_v16 = vpop.f32.mrf.mxu0 }
 0x5fe   : > { %v2400_v7 = vpop.f32.mrf.mxu1  ;;  %v2406_v18 = vpop.f32.mrf.mxu0 }
 0x606   : > { %v2408_v20 = vpop.f32.mrf.mxu0 }
 0x660   : > { %v858_v4 = vpop.f32.mrf.mxu3  ;;  %v838_v13 = vpop.f32.mrf.mxu2 }
 0x661   : > { %v862_v6 = vadd.f32 %v858_v4, %v458_v1  ;;  %v861_v15 = vadd.f32 %v838_v13, %v417_v11 }
 0x663   : > { %1692 = vtanh.f32 %v862_v6  ;;  %v1539_v17 = vmul.f32 -1.442695, %v861_v15  ;;  %v1540_v47 = vmul.f32 -1.442695, %v862_v6 }
 0x665   : > { %1694 = vpow2.f32 %v1539_v17 }
 0x669   : > { %v1693_v9 = vpop.eup %1692 }
 0x66a   : > { %904 = vrot.lane.b32.xlu0 %v1693_v9, %s1987_s1 }
 0x66b   : > { %v1695_v19 = vpop.eup %1694 }
 0x66c   : > { %v869_v21 = vadd.f32 1.0, %v1695_v19 }
 0x66e   : > { %1696 = vrcp.f32 %v869_v21  ;;  %v882_v28 = vand.u32 2147483648, %v869_v21  ;;  %vm876_vm11 = vweird.f32 %v869_v21  ;;  %v880_v30 = vand.u32 2147483647, %v869_v21 }
 0x670   : > { %v883_v33 = vor.u32 1.1754944e-38, %v882_v28  ;;  %vm881_vm13 = vcmp.eq.f32.partialorder %v880_v30, 8.507059e+37 }
 0x674   : > { %v1697_v23 = vpop.eup %1696 }
 0x675   : > { %v872_v26 = vmul.f32 %v1697_v23, %v869_v21  ;;  %vm877_vm10 = vweird.f32 %v1697_v23 }
 0x676   : > { %vm878_vm12 = vmor %vm876_vm11, %vm877_vm10 }
 0x677   : > { %v873_v29 = vsub.f32 1.0, %v872_v26 }
 0x679   : > { %v874_v31 = vmul.f32 %v1697_v23, %v873_v29 }
 0x67b   : > { %v875_v27 = vadd.f32 %v1697_v23, %v874_v31 }
 0x67d   : > { %v879_v32 = vsel %vm878_vm12, %v1697_v23, %v875_v27 }
 0x67e   : > { %v884_v36 = vsel %vm881_vm13, %v883_v33, %v879_v32 }
 0x67f   : > { %v902_v42 = vmul.f32 %v884_v36, %v2348_v59 }
 0x6dc   : > { %v905_v34 = vpop.permute.xlu0 %904 }
 0x6dd   : > { %v907_v37 = vmul.f32 %v905_v34, %v884_v36 }
 0x6df   : > { %909 = vrot.lane.b32.xlu1 %v907_v37, %s1987_s1 }
 0x751   : > { %v910_v43 = vpop.permute.xlu1 %909 }
 0x752   : > { %v2388_v45 = vadd.f32 %v910_v43, %v902_v42 }
 0x754   : > { %1698 = vtanh.f32 %v2388_v45 }
 0x755   : > { %1700 = vpow2.f32 %v1540_v47 }
 0x75a   : > { %v1699_v46 = vpop.eup %1698 }
 0x75b   : > { %915 = vrot.lane.b32.xlu2 %v1699_v46, %s1987_s1  ;;  %v1701_v48 = vpop.eup %1700 }
 0x75c   : > { %v870_v49 = vadd.f32 1.0, %v1701_v48 }
 0x75e   : > { %1702 = vrcp.f32 %v870_v49  ;;  %v897_v55 = vand.u32 2147483648, %v870_v49  ;;  %vm891_vm15 = vweird.f32 %v870_v49  ;;  %v895_v56 = vand.u32 2147483647, %v870_v49 }
 0x760   : > { %v898_v58 = vor.u32 1.1754944e-38, %v897_v55  ;;  %vm896_vm2 = vcmp.eq.f32.partialorder %v895_v56, 8.507059e+37 }
 0x764   : > { %v1703_v50 = vpop.eup %1702 }
 0x765   : > { %v887_v51 = vmul.f32 %v1703_v50, %v870_v49  ;;  %vm892_vm14 = vweird.f32 %v1703_v50  ;;  %v464_v49 = vadd.f32 %v2396_v3, %v2280_v35 }
 0x766   : > { %vm893_vm1 = vmor %vm891_vm15, %vm892_vm14 }
 0x767   : > { %v888_v52 = vsub.f32 1.0, %v887_v51 }
 0x769   : > { %v889_v53 = vmul.f32 %v1703_v50, %v888_v52 }
 0x76b   : > { %v890_v54 = vadd.f32 %v1703_v50, %v889_v53 }
 0x76d   : > { %v894_v57 = vsel %vm893_vm1, %v1703_v50, %v890_v54  ;;  %v423_v54 = vadd.f32 %v2404_v16, %v2284_v41 }
 0x76e   : > { %v899_v59 = vsel %vm896_vm2, %v898_v58, %v894_v57 }
 0x7b5   : > { %v916_v60 = vpop.permute.xlu2 %915 }
 0x7b6   : > { %v918_v62 = vmul.f32 %v916_v60, %v899_v59 }
 0x7b8   : > { %1541 = vmatmul.msk.f32.vlgmr.msrb.gmra.mxu0 %vm365_vm0, %v918_v62  ;;  %1542 = vmatmul.msk.f32.vlgmr.msrb.gmra.mxu1 %vm365_vm0, %v918_v62 }
 0x835   : > { %v962_v10 = vpop.f32.mrf.mxu1  ;;  %v942_v24 = vpop.f32.mrf.mxu0 }
 0x836   : > { %v966_v63 = vadd.f32 %v962_v10, %v461_v61  ;;  %v965_v25 = vadd.f32 %v942_v24, %v420_v22 }
 0x838   : > { %1704 = vtanh.f32 %v966_v63  ;;  %v1543_v0 = vmul.f32 -1.442695, %v965_v25  ;;  %v1544_v32 = vmul.f32 -1.442695, %v966_v63 }
 0x83a   : > { %1706 = vpow2.f32 %v1543_v0 }
 0x83e   : > { %v1705_v12 = vpop.eup %1704 }
 0x83f   : > { %1008 = vrot.lane.b32.xlu0 %v1705_v12, %s1987_s1 }
 0x840   : > { %v1707_v1 = vpop.eup %1706 }
 0x841   : > { %v973_v4 = vadd.f32 1.0, %v1707_v1 }
 0x843   : > { %1708 = vrcp.f32 %v973_v4  ;;  %v986_v15 = vand.u32 2147483648, %v973_v4  ;;  %vm980_vm4 = vweird.f32 %v973_v4  ;;  %v984_v17 = vand.u32 2147483647, %v973_v4 }
 0x845   : > { %v987_v21 = vor.u32 1.1754944e-38, %v986_v15  ;;  %vm985_vm6 = vcmp.eq.f32.partialorder %v984_v17, 8.507059e+37 }
 0x849   : > { %v1709_v6 = vpop.eup %1708 }
 0x84a   : > { %v976_v9 = vmul.f32 %v1709_v6, %v973_v4  ;;  %vm981_vm3 = vweird.f32 %v1709_v6 }
 0x84b   : > { %vm982_vm5 = vmor %vm980_vm4, %vm981_vm3 }
 0x84c   : > { %v977_v8 = vsub.f32 1.0, %v976_v9 }
 0x84e   : > { %v978_v11 = vmul.f32 %v1709_v6, %v977_v8 }
 0x850   : > { %v979_v13 = vadd.f32 %v1709_v6, %v978_v11 }
 0x852   : > { %v983_v19 = vsel %vm982_vm5, %v1709_v6, %v979_v13 }
 0x853   : > { %v988_v26 = vsel %vm985_vm6, %v987_v21, %v983_v19 }
 0x854   : > { %v1006_v31 = vmul.f32 %v988_v26, %v2388_v45 }
 0x8b1   : > { %v1009_v23 = vpop.permute.xlu0 %1008 }
 0x8b2   : > { %v1011_v29 = vmul.f32 %v1009_v23, %v988_v26 }
 0x8b4   : > { %1013 = vrot.lane.b32.xlu1 %v1011_v29, %s1987_s1 }
 0x926   : > { %v1014_v27 = vpop.permute.xlu1 %1013 }
 0x927   : > { %v1016_v28 = vadd.f32 %v1014_v27, %v1006_v31 }
 0x929   : > { %1710 = vtanh.f32 %v1016_v28 }
 0x92a   : > { %1712 = vpow2.f32 %v1544_v32 }
 0x92f   : > { %v1711_v30 = vpop.eup %1710 }
 0x930   : > { %1019 = vrot.lane.b32.xlu2 %v1711_v30, %s1987_s1  ;;  %v1713_v33 = vpop.eup %1712 }
 0x931   : > { %v974_v34 = vadd.f32 1.0, %v1713_v33 }
 0x933   : > { %1714 = vrcp.f32 %v974_v34  ;;  %v1001_v42 = vand.u32 2147483648, %v974_v34  ;;  %vm995_vm8 = vweird.f32 %v974_v34  ;;  %v999_v43 = vand.u32 2147483647, %v974_v34 }
 0x935   : > { %v1002_v45 = vor.u32 1.1754944e-38, %v1001_v42  ;;  %vm1000_vm10 = vcmp.eq.f32.partialorder %v999_v43, 8.507059e+37 }
 0x939   : > { %v1715_v36 = vpop.eup %1714 }
 0x93a   : > { %v991_v37 = vmul.f32 %v1715_v36, %v974_v34  ;;  %vm996_vm7 = vweird.f32 %v1715_v36 }
 0x93b   : > { %vm997_vm9 = vmor %vm995_vm8, %vm996_vm7 }
 0x93c   : > { %v992_v38 = vsub.f32 1.0, %v991_v37 }
 0x93e   : > { %v993_v39 = vmul.f32 %v1715_v36, %v992_v38 }
 0x940   : > { %v994_v40 = vadd.f32 %v1715_v36, %v993_v39 }
 0x942   : > { %v998_v44 = vsel %vm997_vm9, %v1715_v36, %v994_v40  ;;  %v426_v36 = vadd.f32 %v2406_v18, %v2284_v41 }
 0x943   : > { %v1003_v46 = vsel %vm1000_vm10, %v1002_v45, %v998_v44 }
 0x98a   : > { %v1020_v47 = vpop.permute.xlu2 %1019 }
 0x98b   : > { %v1022_v48 = vmul.f32 %v1020_v47, %v1003_v46 }
 0x98d   : > { %1545 = vmatmul.msk.f32.vlgmr.msra.gmra.mxu2 %vm365_vm0, %v1022_v48  ;;  %1546 = vmatmul.msk.f32.vlgmr.msra.gmra.mxu3 %vm365_vm0, %v1022_v48 }
 0xa10   : > { %v1066_v50 = vpop.f32.mrf.mxu3  ;;  %v1046_v53 = vpop.f32.mrf.mxu2 }
 0xa11   : > { %v1070_v51 = vadd.f32 %v1066_v50, %v464_v49  ;;  %v1069_v55 = vadd.f32 %v1046_v53, %v423_v54 }
 0xa13   : > { %1716 = vtanh.f32 %v1070_v51  ;;  %v1547_v56 = vmul.f32 -1.442695, %v1069_v55  ;;  %v1548_v4 = vmul.f32 -1.442695, %v1070_v51 }
 0xa15   : > { %1718 = vpow2.f32 %v1547_v56 }
 0xa19   : > { %v1717_v52 = vpop.eup %1716 }
 0xa1a   : > { %1112 = vrot.lane.b32.xlu0 %v1717_v52, %s1987_s1 }
 0xa1b   : > { %v1719_v57 = vpop.eup %1718 }
 0xa1c   : > { %v1077_v58 = vadd.f32 1.0, %v1719_v57 }
 0xa1e   : > { %1720 = vrcp.f32 %v1077_v58  ;;  %v1090_v61 = vand.u32 2147483648, %v1077_v58  ;;  %vm1084_vm12 = vweird.f32 %v1077_v58  ;;  %v1088_v10 = vand.u32 2147483647, %v1077_v58 }
 0xa20   : > { %v1091_v12 = vor.u32 1.1754944e-38, %v1090_v61  ;;  %vm1089_vm14 = vcmp.eq.f32.partialorder %v1088_v10, 8.507059e+37 }
 0xa24   : > { %v1721_v59 = vpop.eup %1720 }
 0xa25   : > { %v1080_v60 = vmul.f32 %v1721_v59, %v1077_v58  ;;  %vm1085_vm11 = vweird.f32 %v1721_v59 }
 0xa26   : > { %vm1086_vm13 = vmor %vm1084_vm12, %vm1085_vm11 }
 0xa27   : > { %v1081_v62 = vsub.f32 1.0, %v1080_v60 }
 0xa29   : > { %v1082_v2 = vmul.f32 %v1721_v59, %v1081_v62 }
 0xa2b   : > { %v1083_v3 = vadd.f32 %v1721_v59, %v1082_v2 }
 0xa2d   : > { %v1087_v63 = vsel %vm1086_vm13, %v1721_v59, %v1083_v3 }
 0xa2e   : > { %v1092_v16 = vsel %vm1089_vm14, %v1091_v12, %v1087_v63 }
 0xa2f   : > { %v1110_v24 = vmul.f32 %v1092_v16, %v1016_v28  ;;  %v467_v28 = vadd.f32 %v2398_v5, %v2280_v35 }
 0xa8c   : > { %v1113_v14 = vpop.permute.xlu0 %1112 }
 0xa8d   : > { %v1115_v22 = vmul.f32 %v1113_v14, %v1092_v16 }
 0xa8f   : > { %1117 = vrot.lane.b32.xlu1 %v1115_v22, %s1987_s1 }
 0xb01   : > { %v1118_v25 = vpop.permute.xlu1 %1117 }
 0xb02   : > { %v1120_v0 = vadd.f32 %v1118_v25, %v1110_v24  ;;  %v470_v24 = vadd.f32 %v2400_v7, %v2280_v35 }
 0xb04   : > { %1722 = vtanh.f32 %v1120_v0 }
 0xb05   : > { %1724 = vpow2.f32 %v1548_v4 }
 0xb0a   : > { %v1723_v1 = vpop.eup %1722 }
 0xb0b   : > { %1123 = vrot.lane.b32.xlu2 %v1723_v1, %s1987_s1  ;;  %v1725_v6 = vpop.eup %1724 }
 0xb0c   : > { %v1078_v9 = vadd.f32 1.0, %v1725_v6  ;;  %v429_v6 = vadd.f32 %v2408_v20, %v2284_v41 }
 0xb0e   : > { %1726 = vrcp.f32 %v1078_v9  ;;  %v1105_v19 = vand.u32 2147483648, %v1078_v9  ;;  %vm1099_vm1 = vweird.f32 %v1078_v9  ;;  %v1103_v21 = vand.u32 2147483647, %v1078_v9 }
 0xb10   : > { %v1106_v26 = vor.u32 1.1754944e-38, %v1105_v19  ;;  %vm1104_vm3 = vcmp.eq.f32.partialorder %v1103_v21, 8.507059e+37 }
 0xb14   : > { %v1727_v8 = vpop.eup %1726 }
 0xb15   : > { %v1095_v11 = vmul.f32 %v1727_v8, %v1078_v9  ;;  %vm1100_vm15 = vweird.f32 %v1727_v8 }
 0xb16   : > { %vm1101_vm2 = vmor %vm1099_vm1, %vm1100_vm15 }
 0xb17   : > { %v1096_v13 = vsub.f32 1.0, %v1095_v11 }
 0xb19   : > { %v1097_v15 = vmul.f32 %v1727_v8, %v1096_v13 }
 0xb1b   : > { %v1098_v17 = vadd.f32 %v1727_v8, %v1097_v15 }
 0xb1d   : > { %v1102_v23 = vsel %vm1101_vm2, %v1727_v8, %v1098_v17 }
 0xb1e   : > { %v1107_v29 = vsel %vm1104_vm3, %v1106_v26, %v1102_v23 }
 0xb65   : > { %v1124_v31 = vpop.permute.xlu2 %1123 }
 0xb66   : > { %v1126_v27 = vmul.f32 %v1124_v31, %v1107_v29 }
 0xb68   : > { %1549 = vmatmul.msk.f32.vlgmr.msra.gmra.mxu0 %vm365_vm0, %v1126_v27  ;;  %1550 = vmatmul.msk.f32.vlgmr.msra.gmra.mxu1 %vm365_vm0, %v1126_v27  ;;  %v1342_v27 = vld [vmem:[#allocation11 + $0x38] sm:$0xff] }
 0xb69   : > { %1358 = vmatpush.msrb.mxu0 %v1342_v27 }
 0xbe5   : > { %v1170_v30 = vpop.f32.mrf.mxu1  ;;  %v1150_v34 = vpop.f32.mrf.mxu0 }
 0xbe6   : > { %v1174_v32 = vadd.f32 %v1170_v30, %v467_v28  ;;  %v1173_v37 = vadd.f32 %v1150_v34, %v426_v36  ;;  %v1341_v28 = vld [vmem:[#allocation11 + $0x30] sm:$0xff]  ;;  %v1340_v30 = vld [vmem:[#allocation11 + $0x28] sm:$0xff] }
 0xbe7   : > { %1359 = vmatpush.msrb.mxu0 %v1341_v28  ;;  %v1337_v34 = vld [vmem:[#allocation11 + $0x10] sm:$0xff]  ;;  %v1336_v36 = vld [vmem:[#allocation11 + $0x8] sm:$0xff] }
 0xbe8   : > { %1728 = vtanh.f32 %v1174_v32  ;;  %v1551_v38 = vmul.f32 -1.442695, %v1173_v37  ;;  %v1552_v56 = vmul.f32 -1.442695, %v1174_v32  ;;  %v1339_v32 = vld [vmem:[#allocation11 + $0x20] sm:$0xff] }
 0xbe9   : > { %1360 = vmatpush.msrb.mxu0 %v1340_v30 }
 0xbea   : > { %1730 = vpow2.f32 %v1551_v38 }
 0xbeb   : > { %1361 = vmatpush.msrb.mxu0 %v1339_v32 }
 0xbee   : > { %v1729_v33 = vpop.eup %1728 }
 0xbef   : > { %1216 = vrot.lane.b32.xlu0 %v1729_v33, %s1987_s1  ;;  %v1338_v33 = vld [vmem:[#allocation11 + $0x18] sm:$0xff] }
 0xbf0   : > { %v1731_v39 = vpop.eup %1730  ;;  %1362 = vmatpush.msrb.mxu0 %v1338_v33 }
 0xbf1   : > { %v1181_v40 = vadd.f32 1.0, %v1731_v39 }
 0xbf2   : > { %1363 = vmatpush.msrb.mxu0 %v1337_v34 }
 0xbf3   : > { %1732 = vrcp.f32 %v1181_v40  ;;  %v1194_v46 = vand.u32 2147483648, %v1181_v40  ;;  %vm1188_vm5 = vweird.f32 %v1181_v40  ;;  %v1192_v47 = vand.u32 2147483647, %v1181_v40 }
 0xbf4   : > { %1364 = vmatpush.msrb.mxu0 %v1336_v36 }
 0xbf5   : > { %v1195_v49 = vor.u32 1.1754944e-38, %v1194_v46  ;;  %vm1193_vm7 = vcmp.eq.f32.partialorder %v1192_v47, 8.507059e+37 }
 0xbf9   : > { %v1733_v42 = vpop.eup %1732 }
 0xbfa   : > { %v1184_v43 = vmul.f32 %v1733_v42, %v1181_v40  ;;  %vm1189_vm4 = vweird.f32 %v1733_v42 }
 0xbfb   : > { %vm1190_vm6 = vmor %vm1188_vm5, %vm1189_vm4 }
 0xbfc   : > { %v1185_v44 = vsub.f32 1.0, %v1184_v43 }
 0xbfe   : > { %v1186_v5 = vmul.f32 %v1733_v42, %v1185_v44 }
 0xc00   : > { %v1187_v45 = vadd.f32 %v1733_v42, %v1186_v5  ;;  %v1335_v5 = vld [vmem:[#allocation11] sm:$0xff] }
 0xc01   : > { %1365 = vmatpush.msrb.mxu0 %v1335_v5 }
 0xc02   : > { %v1191_v48 = vsel %vm1190_vm6, %v1733_v42, %v1187_v45 }
 0xc03   : > { %v1196_v50 = vsel %vm1193_vm7, %v1195_v49, %v1191_v48 }
 0xc04   : > { %v1214_v52 = vmul.f32 %v1196_v50, %v1120_v0 }
 0xc61   : > { %v1217_v18 = vpop.permute.xlu0 %1216 }
 0xc62   : > { %v1219_v51 = vmul.f32 %v1217_v18, %v1196_v50 }
 0xc64   : > { %1221 = vrot.lane.b32.xlu1 %v1219_v51, %s1987_s1 }
 0xcd6   : > { %v1222_v53 = vpop.permute.xlu1 %1221 }
 0xcd7   : > { %v2431_v54 = vadd.f32 %v1222_v53, %v1214_v52 }
 0xcd9   : > { %1734 = vtanh.f32 %v2431_v54 }
 0xcda   : > { %1736 = vpow2.f32 %v1552_v56  ;;  %v1655_v56 = vld [vmem:[%s2488_s5] ss:$0 sm:$0xff] }
 0xcdf   : > { %v1735_v55 = vpop.eup %1734 }
 0xce0   : > { %1227 = vrot.lane.b32.xlu2 %v1735_v55, %s1987_s1  ;;  %v1737_v57 = vpop.eup %1736 }
 0xce1   : > { %v1182_v58 = vadd.f32 1.0, %v1737_v57 }
 0xce3   : > { %1738 = vrcp.f32 %v1182_v58  ;;  %v1209_v61 = vand.u32 2147483648, %v1182_v58  ;;  %vm1203_vm9 = vweird.f32 %v1182_v58  ;;  %v1207_v10 = vand.u32 2147483647, %v1182_v58 }
 0xce5   : > { %v1210_v12 = vor.u32 1.1754944e-38, %v1209_v61  ;;  %vm1208_vm11 = vcmp.eq.f32.partialorder %v1207_v10, 8.507059e+37 }
 0xce9   : > { %v1739_v59 = vpop.eup %1738 }
 0xcea   : > { %v1199_v60 = vmul.f32 %v1739_v59, %v1182_v58  ;;  %vm1204_vm8 = vweird.f32 %v1739_v59 }
 0xceb   : > { %vm1205_vm10 = vmor %vm1203_vm9, %vm1204_vm8 }
 0xcec   : > { %v1200_v62 = vsub.f32 1.0, %v1199_v60 }
 0xcee   : > { %v1201_v2 = vmul.f32 %v1739_v59, %v1200_v62 }
 0xcf0   : > { %v1202_v3 = vadd.f32 %v1739_v59, %v1201_v2 }
 0xcf2   : > { %v1206_v63 = vsel %vm1205_vm10, %v1739_v59, %v1202_v3 }
 0xcf3   : > { %v1211_v14 = vsel %vm1208_vm11, %v1210_v12, %v1206_v63 }
 0xd3a   : > { %v1228_v16 = vpop.permute.xlu2 %1227 }
 0xd3b   : > { %v1230_v22 = vmul.f32 %v1228_v16, %v1211_v14 }
 0xd3d   : > { %1553 = vmatmul.msk.f32.vlgmr.msrb.gmra.mxu2 %vm365_vm0, %v1230_v22  ;;  %1554 = vmatmul.msk.f32.vlgmr.msrb.gmra.mxu3 %vm365_vm0, %v1230_v22 }
 0xdc0   : > { %v1274_v25 = vpop.f32.mrf.mxu3  ;;  %v1254_v4 = vpop.f32.mrf.mxu2 }
 0xdc1   : > { %v1278_v0 = vadd.f32 %v1274_v25, %v470_v24  ;;  %v1277_v9 = vadd.f32 %v1254_v4, %v429_v6 }
 0xdc3   : > { %1740 = vtanh.f32 %v1278_v0  ;;  %v1555_v8 = vmul.f32 -1.442695, %v1277_v9  ;;  %v1556_v42 = vmul.f32 -1.442695, %v1278_v0 }
 0xdc5   : > { %1742 = vpow2.f32 %v1555_v8 }
 0xdc9   : > { %v1741_v1 = vpop.eup %1740 }
 0xdca   : > { %1320 = vrot.lane.b32.xlu0 %v1741_v1, %s1987_s1 }
 0xdcb   : > { %v1743_v11 = vpop.eup %1742 }
 0xdcc   : > { %v1285_v13 = vadd.f32 1.0, %v1743_v11 }
 0xdce   : > { %1744 = vrcp.f32 %v1285_v13  ;;  %v1298_v21 = vand.u32 2147483648, %v1285_v13  ;;  %vm1292_vm13 = vweird.f32 %v1285_v13  ;;  %v1296_v23 = vand.u32 2147483647, %v1285_v13 }
 0xdd0   : > { %v1299_v29 = vor.u32 1.1754944e-38, %v1298_v21  ;;  %vm1297_vm15 = vcmp.eq.f32.partialorder %v1296_v23, 8.507059e+37 }
 0xdd4   : > { %v1745_v15 = vpop.eup %1744 }
 0xdd5   : > { %v1288_v17 = vmul.f32 %v1745_v15, %v1285_v13  ;;  %vm1293_vm12 = vweird.f32 %v1745_v15 }
 0xdd6   : > { %vm1294_vm14 = vmor %vm1292_vm13, %vm1293_vm12 }
 0xdd7   : > { %v1289_v19 = vsub.f32 1.0, %v1288_v17 }
 0xdd9   : > { %v1290_v35 = vmul.f32 %v1745_v15, %v1289_v19 }
 0xddb   : > { %v1291_v7 = vadd.f32 %v1745_v15, %v1290_v35 }
 0xddd   : > { %v1295_v26 = vsel %vm1294_vm14, %v1745_v15, %v1291_v7 }
 0xdde   : > { %v1300_v20 = vsel %vm1297_vm15, %v1299_v29, %v1295_v26 }
 0xddf   : > { %v1318_v37 = vmul.f32 %v1300_v20, %v2431_v54 }
 0xe3c   : > { %v1321_v41 = vpop.permute.xlu0 %1320 }
 0xe3d   : > { %v1323_v31 = vmul.f32 %v1321_v41, %v1300_v20 }
 0xe3f   : > { %1325 = vrot.lane.b32.xlu1 %v1323_v31, %s1987_s1 }
 0xeb1   : > { %v1326_v38 = vpop.permute.xlu1 %1325 }
 0xeb2   : > { %v1328_v39 = vadd.f32 %v1326_v38, %v1318_v37 }
 0xeb4   : > { %1746 = vtanh.f32 %v1328_v39 }
 0xeb5   : > { %1748 = vpow2.f32 %v1556_v42 }
 0xeba   : > { %v1747_v40 = vpop.eup %1746 }
 0xebb   : > { %1331 = vrot.lane.b32.xlu2 %v1747_v40, %s1987_s1  ;;  %v1749_v43 = vpop.eup %1748  ;;  %s1922_s1 = scalar_lea.hbm %s2489_s6, 16 }
 0xebc   : > { %v1286_v44 = vadd.f32 1.0, %v1749_v43  ;;  %p1924_p9 = scmp.lt.s32.totalorder %s1922_s1, %s1918_s25 }
 0xebe   : > { %1750 = vrcp.f32 %v1286_v44  ;;  %v1313_v18 = vand.u32 2147483648, %v1286_v44  ;;  %vm1307_vm2 = vweird.f32 %v1286_v44  ;;  %v1311_v50 = vand.u32 2147483647, %v1286_v44  ;;  %p1925_p2 = por %p1924_p9, %p1923_p11 }
 0xec0   : > { %v1314_v52 = vor.u32 1.1754944e-38, %v1313_v18  ;;  %vm1312_vm4 = vcmp.eq.f32.partialorder %v1311_v50, 8.507059e+37  ;;  %p1926_p10 = pnand %p1925_p2, %p1921_p8 }
 0xec4   : > { %v1751_v45 = vpop.eup %1750 }
 0xec5   : > { %v1303_v46 = vmul.f32 %v1751_v45, %v1286_v44  ;;  %vm1308_vm1 = vweird.f32 %v1751_v45 }
 0xec6   : > { %vm1309_vm3 = vmor %vm1307_vm2, %vm1308_vm1 }
 0xec7   : > { %v1304_v47 = vsub.f32 1.0, %v1303_v46 }
 0xec9   : > { %v1305_v48 = vmul.f32 %v1751_v45, %v1304_v47 }
 0xecb   : > { %v1306_v49 = vadd.f32 %v1751_v45, %v1305_v48 }
 0xecd   : > { %v1310_v51 = vsel %vm1309_vm3, %v1751_v45, %v1306_v49 }
 0xece   : > { %v1315_v53 = vsel %vm1312_vm4, %v1314_v52, %v1310_v51 }
 0xf15   : > { %v1332_v54 = vpop.permute.xlu2 %1331 }
 0xf16   : > { %v1334_v55 = vmul.f32 %v1332_v54, %v1315_v53 }
 0xf18   : > { %1557 = vmatmul.msk.f32.vlgmr.msrb.gmra.mxu0 %vm365_vm0, %v1334_v55 }
 0xf95   : > { %v1367_v57 = vpop.f32.mrf.mxu0 }
 0xf96   : > { %v1368_v58 = vadd.f32 %v1655_v56, %v1367_v57 }
 0xf98   : > { %1370 = vst [vmem:[%s334_s9] sm:$0xff] %v1368_v58 }
 0xf99   : > { %1929 = shalt.err (!%p1926_p10)
}
 0xf9a   : > { %1580 = dma.vmem_to_hbm [thread:$0]  (%p2117_p5), %s1385_s10, 128, %s1387_s11, %s1372_s12  }
 0xf9b PF: > { %s1398_s30 = sand.u32 1, %s1964_s21   ;;  %p2504_p12 = scmp.ge.s32.totalorder %s1976_s24, 2 }
 0xf9c   : > { %s1399_s15 = scalar_lea.sflag [#allocation5], %s1398_s30 }
 0xf9d   : > { %p1600_p13 = pnand %p2504_p12, %p2058_p6 }
 0xf9f   : > { %p1601_p0 = pneg %p1600_p13 }
 0xfa1   : > { %1959 = dma.done.wait (%p1601_p0), %s1399_s15, 128  }
 0xfa2   : > { %1961 = vsyncadd (%p1601_p0), %s1399_s15, 4294967168  ;;  %p21_p3 = scmp.ge.s32.totalorder %s2104_s17, 4   ;;  %s2505_s21 = smov %s1968_s22 }
 0xfa3   : > { %s2506_s22 = smov %s1972_s23  ;;  %s2507_s23 = smov %s2113_s20 }
 0xfa4   : > { %s2508_s24 = smov %s2104_s17  ;;  %23 = sbr.rel (!%p21_p3) target bundleno = 9 (0x9), region = 112 }
 0xfa9   :  { %1405 = vsyncpa [#allocation4], 1 }
 0xfaa   :  { %1407 = vsyncpa [#allocation4 + $0x1], 1 }
 0xfab   :  { %1408 = vsyncpa [#allocation7], 1 }
 0xfac   :  { %1409 = vsyncpa [#allocation10], 1 }
 0xfad   :  { %1410 = vsyncpa [#allocation5], 1 }
 0xfae   :  { %1412 = vsyncpa [#allocation5 + $0x1], 1 }

</bundles_post_ra>
